<compile_context>
chip_gen: v7x
topology: tpu7x:2x2x1
jax: 0.10.0
libtpu: 0.0.40
codegen_flags: <defaults>
</compile_context>

<pallas_src>
import functools

import jax
import jax.numpy as jnp
from jax.experimental import pallas as pl
from jax.experimental.pallas import tpu as pltpu


# ----------------------------- helpers -----------------------------

def _round_up(n, m):
    return ((n + m - 1) // m) * m


def _mosaic_params(semantics, block_bytes):
    # Explicit scoped-VMEM budget: generous multiple of the resident blocks,
    # floored at 16 MiB (v5e default) and capped well under v7x's 64 MiB physical.
    limit = int(min(max(4 * int(block_bytes) + (2 << 20), 16 << 20), 48 << 20))
    return pltpu.CompilerParams(dimension_semantics=semantics,
                                vmem_limit_bytes=limit)


# ----------------------------- Pallas kernels -----------------------------

def _token_feature_kernel(emb_ref, cw_ref, cmask_ref, cb_ref, *rest,
                          e_dim, kmax, lout, n_highway):
    """Fused token path: fused conv banks + masked max-pool + tanh + highway layers.

      emb_ref:   (nt, Lcp*E)   bf16  lane-dense embedded chars (Lcp = Lc + Kmax - Kmin)
      cw_ref:    (Kmax*E, Dp)  bf16  all conv banks fused, zero-padded
      cmask_ref: (Lout, Dp)    f32   0 where position valid for the bank, -1e30 otherwise
      cb_ref:    (1, Dp)       f32   concatenated conv biases (zero in padded cols)
      hw_w:      (Dp, 2Dp)     bf16  [Wt^T | Wg^T], zero-padded
      hw_b:      (1, 2Dp)      f32   [bt | bg + gate_offset], zero-padded
      out:       (nt, Dp)      bf16
    """
    hw_w_refs = rest[:n_highway]
    hw_b_refs = rest[n_highway:2 * n_highway]
    o_ref = rest[2 * n_highway]

    emb = emb_ref[...]                         # (nt, Lcp*E) bf16
    cw = cw_ref[...]                           # (Kmax*E, Dp) bf16
    cmask = cmask_ref[...]                     # (Lout, Dp) f32
    win = kmax * e_dim

    best = None
    for t in range(lout):                      # small static loop, unrolled
        x_t = emb[:, t * e_dim: t * e_dim + win]               # (nt, Kmax*E)
        z = jnp.dot(x_t, cw, preferred_element_type=jnp.float32)
        z = z + cmask[t:t + 1, :]
        best = z if best is None else jnp.maximum(best, z)
    # tanh is monotone and the bias is position-independent, so max-pool first and
    # apply bias + tanh once.
    feat = jnp.tanh(best + cb_ref[...])        # (nt, Dp) f32, Dp % 128 == 0

    for li in range(n_highway):
        dp = feat.shape[1]
        z = jnp.dot(feat.astype(jnp.bfloat16), hw_w_refs[li][...],
                    preferred_element_type=jnp.float32) + hw_b_refs[li][...]
        h = z[:, :dp]
        g = jax.nn.sigmoid(z[:, dp:])          # gate offset folded into bias
        # NOTE: reference HighwayNetwork.forward never applies its non_linearity,
        # so none is applied here either (exact semantics).
        feat = g * h + (1.0 - g) * feat

    o_ref[...] = feat.astype(o_ref.dtype)


def _linear_kernel(x_ref, w_ref, b_ref, o_ref):
    """(nt, D) @ (D, vt) + (1, vt) -> (nt, vt); bf16 operands, f32 accumulate."""
    o_ref[...] = (jnp.dot(x_ref[...], w_ref[...],
                          preferred_element_type=jnp.float32)
                  + b_ref[...]).astype(o_ref.dtype)


def _lstm_recurrence_kernel(xp_ref, whh_ref, o_ref, h_scr, c_scr, *, hidden, t_blk):
    """Blocked LSTM recurrence (PyTorch gate order i, f, g, o).

    xp_ref:  (t_blk, Bp, 4H) bf16  precomputed x@W_ih^T + b_ih + b_hh
    whh_ref: (H, 4H)         bf16
    o_ref:   (t_blk, Bp, H)  bf16
    h_scr, c_scr: (Bp, H)    f32  carried state
    """
    @pl.when(pl.program_id(0) == 0)
    def _():
        h_scr[...] = jnp.zeros_like(h_scr)
        c_scr[...] = jnp.zeros_like(c_scr)

    h = h_scr[...]
    c = c_scr[...]
    whh = whh_ref[...]
    for tt in range(t_blk):                    # small static unroll (vreg-pressure safe)
        gates = xp_ref[tt].astype(jnp.float32) + jnp.dot(
            h.astype(jnp.bfloat16), whh, preferred_element_type=jnp.float32)
        i = jax.nn.sigmoid(gates[:, 0 * hidden:1 * hidden])
        f = jax.nn.sigmoid(gates[:, 1 * hidden:2 * hidden])
        g = jnp.tanh(gates[:, 2 * hidden:3 * hidden])
        o = jax.nn.sigmoid(gates[:, 3 * hidden:4 * hidden])
        c = f * c + i * g
        h = o * jnp.tanh(c)
        o_ref[tt] = h.astype(o_ref.dtype)
    h_scr[...] = h
    c_scr[...] = c


# ----------------------------- wrappers -----------------------------

def token_features(emb2d, conv_w, conv_mask, conv_b, hw_w, hw_b, *, e_dim, kmax, nt):
    """Fused conv+highway path, tiled over tokens. emb2d: (N, Lcp*E) bf16 -> (N, Dp) bf16."""
    n_pad, lce = emb2d.shape
    dp = conv_w.shape[1]
    lout = conv_mask.shape[0]
    n_highway = len(hw_w)

    kernel = functools.partial(_token_feature_kernel, e_dim=e_dim, kmax=kmax,
                               lout=lout, n_highway=n_highway)

    in_specs = [pl.BlockSpec((nt, lce), lambda i: (i, 0)),
                pl.BlockSpec(conv_w.shape, lambda i: (0, 0)),
                pl.BlockSpec(conv_mask.shape, lambda i: (0, 0)),
                pl.BlockSpec(conv_b.shape, lambda i: (0, 0))]
    in_specs += [pl.BlockSpec(w.shape, lambda i: (0, 0)) for w in hw_w]
    in_specs += [pl.BlockSpec(bb.shape, lambda i: (0, 0)) for bb in hw_b]

    blk_bytes = (nt * lce * 2 + int(conv_w.size) * 2 + int(conv_mask.size) * 4
                 + int(conv_b.size) * 4
                 + sum(int(w.size) * 2 for w in hw_w)
                 + sum(int(bb.size) * 4 for bb in hw_b)
                 + nt * dp * 2)

    return pl.pallas_call(
        kernel,
        out_shape=jax.ShapeDtypeStruct((n_pad, dp), jnp.bfloat16),
        grid=(n_pad // nt,),
        in_specs=in_specs,
        out_specs=pl.BlockSpec((nt, dp), lambda i: (i, 0)),
        compiler_params=_mosaic_params(("parallel",), blk_bytes),
    )(emb2d, conv_w, conv_mask, conv_b, *hw_w, *hw_b)


def linear_bias(x, w, b_row, *, out_dtype, row_tile, col_tile):
    """x (N, D) @ w (D, V) + b (1, V) -> (N, V) out_dtype.

    row_tile/col_tile = None means that dim stays a single (resident) block.
    col_tile=None keeps the weight's index_map constant so it is not re-streamed.
    """
    n, d = x.shape
    v = w.shape[1]
    x = x.astype(jnp.bfloat16)

    if row_tile is None or n <= row_tile:
        nt, n_pad = n, n
    else:
        nt = row_tile
        n_pad = _round_up(n, nt)
    if n_pad != n:
        x = jnp.pad(x, ((0, n_pad - n), (0, 0)))

    if col_tile is None or v <= col_tile:
        vt, v_pad = v, v
    else:
        vt = col_tile
        v_pad = _round_up(v, vt)
    if v_pad != v:
        w = jnp.pad(w, ((0, 0), (0, v_pad - v)))
        b_row = jnp.pad(b_row, ((0, 0), (0, v_pad - v)))

    blk_bytes = nt * d * 2 + d * vt * 2 + vt * 4 + nt * vt * jnp.dtype(out_dtype).itemsize
    out = pl.pallas_call(
        _linear_kernel,
        out_shape=jax.ShapeDtypeStruct((n_pad, v_pad), out_dtype),
        grid=(n_pad // nt, v_pad // vt),
        in_specs=[pl.BlockSpec((nt, d), lambda i, j: (i, 0)),
                  pl.BlockSpec((d, vt), lambda i, j: (0, j)),
                  pl.BlockSpec((1, vt), lambda i, j: (0, j))],
        out_specs=pl.BlockSpec((nt, vt), lambda i, j: (i, j)),
        compiler_params=_mosaic_params(("parallel", "parallel"), blk_bytes),
    )(x, w, b_row)
    if n_pad != n or v_pad != v:
        out = out[:n, :v]
    return out


def lstm_recurrence(xproj, whh_t, *, t_blk):
    """xproj: (S_pad, Bp, 4H) bf16 time-major (bias already added). Returns (S_pad, Bp, H) bf16."""
    s_pad, bp, g4 = xproj.shape
    h = g4 // 4
    assert s_pad % t_blk == 0

    blk_bytes = t_blk * bp * g4 * 2 + h * g4 * 2 + t_blk * bp * h * 2 + 2 * bp * h * 4
    return pl.pallas_call(
        functools.partial(_lstm_recurrence_kernel, hidden=h, t_blk=t_blk),
        out_shape=jax.ShapeDtypeStruct((s_pad, bp, h), jnp.bfloat16),
        grid=(s_pad // t_blk,),
        in_specs=[pl.BlockSpec((t_blk, bp, g4), lambda t: (t, 0, 0)),
                  pl.BlockSpec((h, g4), lambda t: (0, 0))],
        out_specs=pl.BlockSpec((t_blk, bp, h), lambda t: (t, 0, 0)),
        scratch_shapes=[pltpu.VMEM((bp, h), jnp.float32),
                        pltpu.VMEM((bp, h), jnp.float32)],
        compiler_params=_mosaic_params(("arbitrary",), blk_bytes),
    )(xproj, whh_t)


# ----------------------------- params -----------------------------

def init_params_torch_layout(key, cfg):
    """Random params in the same layouts torch would use."""
    def nrm(k, shape):
        return 0.1 * jax.random.normal(k, shape, dtype=jnp.float32)

    keys = iter(jax.random.split(key, 64))
    params = {}

    emb = nrm(next(keys), (cfg["char_vocabulary_size"], cfg["char_embedding_dim"]))
    emb = emb.at[cfg["char_padding_idx"]].set(0.0)          # padding_idx row is zero
    params["char_embedding"] = emb

    params["convs"] = []
    for f_num, k_size in zip(cfg["char_convolutional_filter_numbers"],
                             cfg["char_convolutional_filter_sizes"]):
        w = nrm(next(keys), (f_num, cfg["char_embedding_dim"], k_size))  # (F, C, K)
        b = nrm(next(keys), (f_num,))
        params["convs"].append((w, b))

    feat = int(sum(cfg["char_convolutional_filter_numbers"]))
    params["highway"] = []
    for _ in range(cfg["highway_layers"]):
        params["highway"].append((nrm(next(keys), (feat, feat)), nrm(next(keys), (feat,)),
                                  nrm(next(keys), (feat, feat)), nrm(next(keys), (feat,))))

    params["lstm"] = []
    d_in = feat
    for _ in range(cfg["lstm_layers"]):
        h = cfg["lstm_dim"]
        params["lstm"].append((nrm(next(keys), (4 * h, d_in)),   # weight_ih (4H, D)
                               nrm(next(keys), (4 * h, h)),      # weight_hh (4H, H)
                               nrm(next(keys), (4 * h,)),        # b_ih
                               nrm(next(keys), (4 * h,))))       # b_hh
        d_in = h

    params["logits"] = (nrm(next(keys), (cfg["word_vocabulary_size"], cfg["lstm_dim"])),
                        nrm(next(keys), (cfg["word_vocabulary_size"],)))
    return params


def prepare_params(raw, cfg):
    """Convert torch-layout params to kernel layouts (bf16 matmul operands, f32 biases)."""
    f32 = jnp.float32
    sizes = [int(k) for k in cfg["char_convolutional_filter_sizes"]]
    filters = [int(f) for f in cfg["char_convolutional_filter_numbers"]]
    e = int(cfg["char_embedding_dim"])
    kmax, kmin = max(sizes), min(sizes)
    d = int(sum(filters))
    dp = _round_up(d, 128)                                   # lane-dense feature width

    p = {"e_dim": e, "kmax": kmax, "kmin": kmin, "d": d, "dp": dp}
    p["char_embedding"] = raw["char_embedding"].astype(jnp.bfloat16)

    # Fuse all conv banks into a single (Kmax*E, Dp) weight: zero rows for kernel taps
    # a bank does not use, zero columns padding sum(F) up to Dp.
    conv_w = jnp.zeros((kmax * e, dp), f32)
    conv_b = jnp.zeros((1, dp), f32)
    col = 0
    for (w, bc), k, f_num in zip(raw["convs"], sizes, filters):
        w_t = jnp.transpose(w, (2, 1, 0)).reshape(k * e, f_num)   # (F,E,K)->(K,E,F)->(K*E,F)
        conv_w = conv_w.at[:k * e, col:col + f_num].set(w_t)
        conv_b = conv_b.at[0, col:col + f_num].set(bc)
        col += f_num
    p["conv_w"] = conv_w.astype(jnp.bfloat16)
    p["conv_b"] = conv_b

    off = float(cfg["transform_gate_bias_offset"])
    hw_w, hw_b = [], []
    for (wt, bt, wg, bg) in raw["highway"]:
        w_pad = jnp.zeros((dp, 2 * dp), f32)
        w_pad = w_pad.at[:d, :d].set(wt.T).at[:d, dp:dp + d].set(wg.T)
        b_pad = jnp.zeros((1, 2 * dp), f32)
        b_pad = b_pad.at[0, :d].set(bt).at[0, dp:dp + d].set(bg + off)
        hw_w.append(w_pad.astype(jnp.bfloat16))
        hw_b.append(b_pad)
    p["hw_w"], p["hw_b"] = hw_w, hw_b

    lstm = []
    d_in_eff = dp
    for (w_ih, w_hh, b_ih, b_hh) in raw["lstm"]:
        h4, d_in = w_ih.shape
        h = h4 // 4
        wih_t = jnp.zeros((d_in_eff, h4), f32).at[:d_in, :].set(w_ih.T)   # (Dp or H, 4H)
        lstm.append((wih_t.astype(jnp.bfloat16),
                     w_hh.T.astype(jnp.bfloat16),                        # (H, 4H)
                     (b_ih + b_hh).reshape(1, -1).astype(f32)))
        d_in_eff = h
    p["lstm"] = lstm

    w_out, b_out = raw["logits"]
    p["logits"] = (w_out.T.astype(jnp.bfloat16),                          # (H, V)
                   b_out.reshape(1, -1).astype(f32))
    return p


# ----------------------------- model forward -----------------------------

def character_language_model_forward(x_idx, params, cfg):
    """x_idx: (batch, seq, char_len) int32 -> logits (batch, word_vocab) f32."""
    b, s, lc = x_idx.shape
    sizes = [int(k) for k in cfg["char_convolutional_filter_sizes"]]
    filters = [int(f) for f in cfg["char_convolutional_filter_numbers"]]
    e = params["e_dim"]
    kmax, kmin = params["kmax"], params["kmin"]
    dp = params["dp"]
    assert lc >= kmax, "char_len must be >= the largest conv kernel size"

    # ---- padded, time-major token layout, chosen ONCE and kept end-to-end ----
    bp = _round_up(max(b, 1), 8)                      # sublane-friendly batch
    t_blk = 8                                         # recurrence steps per grid step
    steps_per_tile = max(1, 256 // bp)                # ~256 token rows per tile
    if steps_per_tile >= t_blk:
        steps_per_tile = (steps_per_tile // t_blk) * t_blk
    else:
        steps_per_tile = 1 << (steps_per_tile.bit_length() - 1)   # 1, 2 or 4
    steps_per_tile = min(steps_per_tile, _round_up(s, t_blk))
    quantum = max(steps_per_tile, t_blk)              # multiple of both
    s_pad = _round_up(s, quantum)
    nt = steps_per_tile * bp                          # token rows per tile (multiple of 8)
    n_pad = s_pad * bp                                # multiple of nt

    tok = jnp.transpose(x_idx, (1, 0, 2))             # (S, B, Lc), time-major
    tok = jnp.pad(tok, ((0, s_pad - s), (0, bp - b), (0, 0)))
    tok = tok.reshape(n_pad, lc)

    # char embedding gather (XLA glue), lane-dense (N, Lc*E); zero-pad chars so every
    # Kmax-wide conv window stays in bounds.
    # TODO(synk): this gather could be fused into the token kernel (one-hot matmul).
    emb2d = params["char_embedding"][tok].reshape(n_pad, lc * e)
    lc_pad = lc + (kmax - kmin)
    if lc_pad != lc:
        emb2d = jnp.pad(emb2d, ((0, 0), (0, (lc_pad - lc) * e)))

    # per-position validity mask (0 valid / -1e30 invalid) per bank column range
    lout = lc - kmin + 1
    cmask = jnp.zeros((lout, dp), jnp.float32)
    col = 0
    for f_num, k in zip(filters, sizes):
        valid = lc - k + 1
        if valid < lout:
            cmask = cmask.at[valid:, col:col + f_num].set(-1e30)
        col += f_num

    feat = token_features(emb2d, params["conv_w"], cmask, params["conv_b"],
                          params["hw_w"], params["hw_b"],
                          e_dim=e, kmax=kmax, nt=nt)          # (N_pad, Dp) bf16

    out = None
    for (wih_t, whh_t, bias_row) in params["lstm"]:
        hdim = whh_t.shape[0]
        # hoisted input projection for ALL timesteps; weight resident (untiled cols)
        xproj = linear_bias(feat, wih_t, bias_row, out_dtype=jnp.bfloat16,
                            row_tile=nt, col_tile=None)        # (N_pad, 4H) bf16
        xproj = xproj.reshape(s_pad, bp, 4 * hdim)
        out = lstm_recurrence(xproj, whh_t, t_blk=t_blk)       # (S_pad, Bp, H) bf16
        feat = out.reshape(n_pad, hdim)
        # TODO(synk): inter-layer LSTM dropout and the final nn.Dropout are stochastic
        # train-time ops; identity here (eval mode).

    last = out[s - 1]                                          # (Bp, H) last real timestep
    w_out_t, b_out_row = params["logits"]
    logits = linear_bias(last, w_out_t, b_out_row, out_dtype=jnp.float32,
                         row_tile=None, col_tile=512)          # (Bp, V) f32
    return logits[:b]


# ----------------------------- main -----------------------------

if __name__ == "__main__":
    cfg = dict(
        char_vocabulary_size=16,
        char_embedding_dim=8,
        char_padding_idx=0,
        char_convolutional_filter_numbers=[6, 10],
        char_convolutional_filter_sizes=[2, 3],
        highway_layers=1,
        lstm_layers=1,
        lstm_dim=32,
        dropout_prob=0.1,
        word_vocabulary_size=24,
        transform_gate_bias_offset=-2,
    )

    key = jax.random.PRNGKey(0)
    k_params, k_input = jax.random.split(key)
    raw_params = init_params_torch_layout(k_params, cfg)
    params = prepare_params(raw_params, cfg)

    batch, seq_len, char_len = 2, 4, 6
    x_idx = jax.random.randint(
        k_input, (batch, seq_len, char_len), 0, cfg["char_vocabulary_size"],
        dtype=jnp.int32)

    fwd = jax.jit(lambda xi: character_language_model_forward(xi, params, cfg))
    out = jax.block_until_ready(fwd(x_idx))

    assert out.shape == (batch, cfg["word_vocabulary_size"])
    assert out.dtype == jnp.float32
    assert bool(jnp.all(jnp.isfinite(out)))
    print("KERNEL_OK")
</pallas_src>

<mosaic_0001>
module attributes {stable_mosaic.version = 11 : i64} {
  func.func @_token_feature_kernel(%arg0: i32, %arg1: memref<64x56xbf16, #tpu.memory_space<vmem>>, %arg2: memref<24x128xbf16, #tpu.memory_space<vmem>>, %arg3: memref<5x128xf32, #tpu.memory_space<vmem>>, %arg4: memref<1x128xf32, #tpu.memory_space<vmem>>, %arg5: memref<128x256xbf16, #tpu.memory_space<vmem>>, %arg6: memref<1x256xf32, #tpu.memory_space<vmem>>, %arg7: memref<64x128xbf16, #tpu.memory_space<vmem>>) attributes {dimension_semantics = [#tpu.dimension_semantics<parallel>], iteration_bounds = array<i64: 1>, scalar_prefetch = 0 : i64, scratch_operands = 0 : i64, tpu.core_type = #tpu.core_type<tc>, window_params = [{transform_indices = @transform_0, window_bounds = array<i64: 64, 56>}, {pipeline_mode = #tpu.pipeline_mode<synchronous>, transform_indices = @transform_1, window_bounds = array<i64: 24, 128>}, {pipeline_mode = #tpu.pipeline_mode<synchronous>, transform_indices = @transform_2, window_bounds = array<i64: 5, 128>}, {pipeline_mode = #tpu.pipeline_mode<synchronous>, transform_indices = @transform_3, window_bounds = array<i64: 1, 128>}, {pipeline_mode = #tpu.pipeline_mode<synchronous>, transform_indices = @transform_4, window_bounds = array<i64: 128, 256>}, {pipeline_mode = #tpu.pipeline_mode<synchronous>, transform_indices = @transform_5, window_bounds = array<i64: 1, 256>}, {transform_indices = @transform_6, window_bounds = array<i64: 64, 128>}]} {
    %c0 = arith.constant 0 : index
    %c0_0 = arith.constant 0 : index
    %0 = vector.load %arg1[%c0, %c0_0] : memref<64x56xbf16, #tpu.memory_space<vmem>>, vector<64x56xbf16>
    %c0_1 = arith.constant 0 : index
    %c0_2 = arith.constant 0 : index
    %1 = vector.load %arg2[%c0_1, %c0_2] : memref<24x128xbf16, #tpu.memory_space<vmem>>, vector<24x128xbf16>
    %c0_3 = arith.constant 0 : index
    %c0_4 = arith.constant 0 : index
    %2 = vector.load %arg3[%c0_3, %c0_4] : memref<5x128xf32, #tpu.memory_space<vmem>>, vector<5x128xf32>
    %3 = vector.extract_strided_slice %0 {offsets = [0, 0], sizes = [64, 24], strides = [1, 1]} : vector<64x56xbf16> to vector<64x24xbf16>
    %cst = arith.constant dense<0.000000e+00> : vector<64x128xf32>
    %4 = tpu.matmul %3, %1, %cst {dimension_numbers = #tpu.dot_dimension_numbers<[1], [0], [0], [1], [0, 0, 1, 1], [], []>} : vector<64x24xbf16>, vector<24x128xbf16>, vector<64x128xf32> -> vector<64x128xf32>
    %5 = vector.extract_strided_slice %2 {offsets = [0, 0], sizes = [1, 128], strides = [1, 1]} : vector<5x128xf32> to vector<1x128xf32>
    %6 = vector.broadcast %5 : vector<1x128xf32> to vector<64x128xf32>
    %7 = arith.addf %4, %6 : vector<64x128xf32>
    %8 = vector.extract_strided_slice %0 {offsets = [0, 8], sizes = [64, 24], strides = [1, 1]} : vector<64x56xbf16> to vector<64x24xbf16>
    %cst_5 = arith.constant dense<0.000000e+00> : vector<64x128xf32>
    %9 = tpu.matmul %8, %1, %cst_5 {dimension_numbers = #tpu.dot_dimension_numbers<[1], [0], [0], [1], [0, 0, 1, 1], [], []>} : vector<64x24xbf16>, vector<24x128xbf16>, vector<64x128xf32> -> vector<64x128xf32>
    %10 = vector.extract_strided_slice %2 {offsets = [1, 0], sizes = [1, 128], strides = [1, 1]} : vector<5x128xf32> to vector<1x128xf32>
    %11 = vector.broadcast %10 : vector<1x128xf32> to vector<64x128xf32>
    %12 = arith.addf %9, %11 : vector<64x128xf32>
    %13 = arith.maximumf %7, %12 : vector<64x128xf32>
    %14 = vector.extract_strided_slice %0 {offsets = [0, 16], sizes = [64, 24], strides = [1, 1]} : vector<64x56xbf16> to vector<64x24xbf16>
    %cst_6 = arith.constant dense<0.000000e+00> : vector<64x128xf32>
    %15 = tpu.matmul %14, %1, %cst_6 {dimension_numbers = #tpu.dot_dimension_numbers<[1], [0], [0], [1], [0, 0, 1, 1], [], []>} : vector<64x24xbf16>, vector<24x128xbf16>, vector<64x128xf32> -> vector<64x128xf32>
    %16 = vector.extract_strided_slice %2 {offsets = [2, 0], sizes = [1, 128], strides = [1, 1]} : vector<5x128xf32> to vector<1x128xf32>
    %17 = vector.broadcast %16 : vector<1x128xf32> to vector<64x128xf32>
    %18 = arith.addf %15, %17 : vector<64x128xf32>
    %19 = arith.maximumf %13, %18 : vector<64x128xf32>
    %20 = vector.extract_strided_slice %0 {offsets = [0, 24], sizes = [64, 24], strides = [1, 1]} : vector<64x56xbf16> to vector<64x24xbf16>
    %cst_7 = arith.constant dense<0.000000e+00> : vector<64x128xf32>
    %21 = tpu.matmul %20, %1, %cst_7 {dimension_numbers = #tpu.dot_dimension_numbers<[1], [0], [0], [1], [0, 0, 1, 1], [], []>} : vector<64x24xbf16>, vector<24x128xbf16>, vector<64x128xf32> -> vector<64x128xf32>
    %22 = vector.extract_strided_slice %2 {offsets = [3, 0], sizes = [1, 128], strides = [1, 1]} : vector<5x128xf32> to vector<1x128xf32>
    %23 = vector.broadcast %22 : vector<1x128xf32> to vector<64x128xf32>
    %24 = arith.addf %21, %23 : vector<64x128xf32>
    %25 = arith.maximumf %19, %24 : vector<64x128xf32>
    %26 = vector.extract_strided_slice %0 {offsets = [0, 32], sizes = [64, 24], strides = [1, 1]} : vector<64x56xbf16> to vector<64x24xbf16>
    %cst_8 = arith.constant dense<0.000000e+00> : vector<64x128xf32>
    %27 = tpu.matmul %26, %1, %cst_8 {dimension_numbers = #tpu.dot_dimension_numbers<[1], [0], [0], [1], [0, 0, 1, 1], [], []>} : vector<64x24xbf16>, vector<24x128xbf16>, vector<64x128xf32> -> vector<64x128xf32>
    %28 = vector.extract_strided_slice %2 {offsets = [4, 0], sizes = [1, 128], strides = [1, 1]} : vector<5x128xf32> to vector<1x128xf32>
    %29 = vector.broadcast %28 : vector<1x128xf32> to vector<64x128xf32>
    %30 = arith.addf %27, %29 : vector<64x128xf32>
    %31 = arith.maximumf %25, %30 : vector<64x128xf32>
    %c0_9 = arith.constant 0 : index
    %c0_10 = arith.constant 0 : index
    %32 = vector.load %arg4[%c0_9, %c0_10] : memref<1x128xf32, #tpu.memory_space<vmem>>, vector<1x128xf32>
    %33 = vector.broadcast %32 : vector<1x128xf32> to vector<64x128xf32>
    %34 = arith.addf %31, %33 : vector<64x128xf32>
    %35 = math.tanh %34 : vector<64x128xf32>
    %36 = arith.truncf %35 : vector<64x128xf32> to vector<64x128xbf16>
    %c0_11 = arith.constant 0 : index
    %c0_12 = arith.constant 0 : index
    %37 = vector.load %arg5[%c0_11, %c0_12] : memref<128x256xbf16, #tpu.memory_space<vmem>>, vector<128x256xbf16>
    %cst_13 = arith.constant dense<0.000000e+00> : vector<64x256xf32>
    %38 = tpu.matmul %36, %37, %cst_13 {dimension_numbers = #tpu.dot_dimension_numbers<[1], [0], [0], [1], [0, 0, 1, 1], [], []>} : vector<64x128xbf16>, vector<128x256xbf16>, vector<64x256xf32> -> vector<64x256xf32>
    %c0_14 = arith.constant 0 : index
    %c0_15 = arith.constant 0 : index
    %39 = vector.load %arg6[%c0_14, %c0_15] : memref<1x256xf32, #tpu.memory_space<vmem>>, vector<1x256xf32>
    %40 = vector.broadcast %39 : vector<1x256xf32> to vector<64x256xf32>
    %41 = arith.addf %38, %40 : vector<64x256xf32>
    %42 = vector.extract_strided_slice %41 {offsets = [0, 0], sizes = [64, 128], strides = [1, 1]} : vector<64x256xf32> to vector<64x128xf32>
    %43 = vector.extract_strided_slice %41 {offsets = [0, 128], sizes = [64, 128], strides = [1, 1]} : vector<64x256xf32> to vector<64x128xf32>
    %44 = arith.negf %43 : vector<64x128xf32>
    %45 = math.exp %44 : vector<64x128xf32>
    %cst_16 = arith.constant 1.000000e+00 : f32
    %46 = vector.broadcast %cst_16 : f32 to vector<64x128xf32>
    %47 = arith.addf %46, %45 : vector<64x128xf32>
    %48 = arith.divf %46, %47 : vector<64x128xf32>
    %49 = arith.mulf %48, %42 : vector<64x128xf32>
    %cst_17 = arith.constant 1.000000e+00 : f32
    %50 = vector.broadcast %cst_17 : f32 to vector<64x128xf32>
    %51 = arith.subf %50, %48 : vector<64x128xf32>
    %52 = arith.mulf %51, %35 : vector<64x128xf32>
    %53 = arith.addf %49, %52 : vector<64x128xf32>
    %54 = arith.truncf %53 : vector<64x128xf32> to vector<64x128xbf16>
    %c0_18 = arith.constant 0 : index
    %c0_19 = arith.constant 0 : index
    %55 = vector.load %arg7[%c0_18, %c0_19] : memref<64x128xbf16, #tpu.memory_space<vmem>>, vector<64x128xbf16>
    tpu.vector_store %arg7[%c0_18, %c0_19], %54 {strides = array<i32>} : memref<64x128xbf16, #tpu.memory_space<vmem>>, vector<64x128xbf16>,
    return
  }
  func.func @transform_0(%arg0: i32) -> (i32, i32) {
    %c0_i32 = arith.constant 0 : i32
    %c0_i32_0 = arith.constant 0 : i32
    return %arg0, %c0_i32 : i32, i32
  }
  func.func @transform_1(%arg0: i32) -> (i32, i32) {
    %c0_i32 = arith.constant 0 : i32
    %c0_i32_0 = arith.constant 0 : i32
    %c0_i32_1 = arith.constant 0 : i32
    return %c0_i32, %c0_i32_0 : i32, i32
  }
  func.func @transform_2(%arg0: i32) -> (i32, i32) {
    %c0_i32 = arith.constant 0 : i32
    %c0_i32_0 = arith.constant 0 : i32
    %c0_i32_1 = arith.constant 0 : i32
    return %c0_i32, %c0_i32_0 : i32, i32
  }
  func.func @transform_3(%arg0: i32) -> (i32, i32) {
    %c0_i32 = arith.constant 0 : i32
    %c0_i32_0 = arith.constant 0 : i32
    %c0_i32_1 = arith.constant 0 : i32
    return %c0_i32, %c0_i32_0 : i32, i32
  }
  func.func @transform_4(%arg0: i32) -> (i32, i32) {
    %c0_i32 = arith.constant 0 : i32
    %c0_i32_0 = arith.constant 0 : i32
    %c0_i32_1 = arith.constant 0 : i32
    return %c0_i32, %c0_i32_0 : i32, i32
  }
  func.func @transform_5(%arg0: i32) -> (i32, i32) {
    %c0_i32 = arith.constant 0 : i32
    %c0_i32_0 = arith.constant 0 : i32
    %c0_i32_1 = arith.constant 0 : i32
    return %c0_i32, %c0_i32_0 : i32, i32
  }
  func.func @transform_6(%arg0: i32) -> (i32, i32) {
    %c0_i32 = arith.constant 0 : i32
    %c0_i32_0 = arith.constant 0 : i32
    return %arg0, %c0_i32 : i32, i32
  }
}

module attributes {stable_mosaic.version = 11 : i64} {
  func.func @_linear_kernel(%arg0: i32, %arg1: i32, %arg2: memref<64x128xbf16, #tpu.memory_space<vmem>>, %arg3: memref<128x128xbf16, #tpu.memory_space<vmem>>, %arg4: memref<1x128xf32, #tpu.memory_space<vmem>>, %arg5: memref<64x128xbf16, #tpu.memory_space<vmem>>) attributes {dimension_semantics = [#tpu.dimension_semantics<parallel>, #tpu.dimension_semantics<parallel>], iteration_bounds = array<i64: 1, 1>, scalar_prefetch = 0 : i64, scratch_operands = 0 : i64, tpu.core_type = #tpu.core_type<tc>, window_params = [{transform_indices = @transform_0, window_bounds = array<i64: 64, 128>}, {transform_indices = @transform_1, window_bounds = array<i64: 128, 128>}, {transform_indices = @transform_2, window_bounds = array<i64: 1, 128>}, {transform_indices = @transform_3, window_bounds = array<i64: 64, 128>}]} {
    %c0 = arith.constant 0 : index
    %c0_0 = arith.constant 0 : index
    %0 = vector.load %arg2[%c0, %c0_0] : memref<64x128xbf16, #tpu.memory_space<vmem>>, vector<64x128xbf16>
    %c0_1 = arith.constant 0 : index
    %c0_2 = arith.constant 0 : index
    %1 = vector.load %arg3[%c0_1, %c0_2] : memref<128x128xbf16, #tpu.memory_space<vmem>>, vector<128x128xbf16>
    %cst = arith.constant dense<0.000000e+00> : vector<64x128xf32>
    %2 = tpu.matmul %0, %1, %cst {dimension_numbers = #tpu.dot_dimension_numbers<[1], [0], [0], [1], [0, 0, 1, 1], [], []>} : vector<64x128xbf16>, vector<128x128xbf16>, vector<64x128xf32> -> vector<64x128xf32>
    %c0_3 = arith.constant 0 : index
    %c0_4 = arith.constant 0 : index
    %3 = vector.load %arg4[%c0_3, %c0_4] : memref<1x128xf32, #tpu.memory_space<vmem>>, vector<1x128xf32>
    %4 = vector.broadcast %3 : vector<1x128xf32> to vector<64x128xf32>
    %5 = arith.addf %2, %4 : vector<64x128xf32>
    %6 = arith.truncf %5 : vector<64x128xf32> to vector<64x128xbf16>
    %c0_5 = arith.constant 0 : index
    %c0_6 = arith.constant 0 : index
    %7 = vector.load %arg5[%c0_5, %c0_6] : memref<64x128xbf16, #tpu.memory_space<vmem>>, vector<64x128xbf16>
    tpu.vector_store %arg5[%c0_5, %c0_6], %6 {strides = array<i32>} : memref<64x128xbf16, #tpu.memory_space<vmem>>, vector<64x128xbf16>,
    return
  }
  func.func @transform_0(%arg0: i32, %arg1: i32) -> (i32, i32) {
    %c0_i32 = arith.constant 0 : i32
    %c0_i32_0 = arith.constant 0 : i32
    return %arg0, %c0_i32 : i32, i32
  }
  func.func @transform_1(%arg0: i32, %arg1: i32) -> (i32, i32) {
    %c0_i32 = arith.constant 0 : i32
    %c0_i32_0 = arith.constant 0 : i32
    return %c0_i32, %arg1 : i32, i32
  }
  func.func @transform_2(%arg0: i32, %arg1: i32) -> (i32, i32) {
    %c0_i32 = arith.constant 0 : i32
    %c0_i32_0 = arith.constant 0 : i32
    return %c0_i32, %arg1 : i32, i32
  }
  func.func @transform_3(%arg0: i32, %arg1: i32) -> (i32, i32) {
    %c0_i32 = arith.constant 0 : i32
    return %arg0, %arg1 : i32, i32
  }
}

module attributes {stable_mosaic.version = 11 : i64} {
  func.func @_lstm_recurrence_kernel(%arg0: i32, %arg1: memref<8x8x128xbf16, #tpu.memory_space<vmem>>, %arg2: memref<32x128xbf16, #tpu.memory_space<vmem>>, %arg3: memref<8x8x32xbf16, #tpu.memory_space<vmem>>, %arg4: memref<8x32xf32, #tpu.memory_space<vmem>>, %arg5: memref<8x32xf32, #tpu.memory_space<vmem>>) attributes {dimension_semantics = [#tpu.dimension_semantics<arbitrary>], iteration_bounds = array<i64: 1>, scalar_prefetch = 0 : i64, scratch_operands = 2 : i64, tpu.core_type = #tpu.core_type<tc>, window_params = [{transform_indices = @transform_0, window_bounds = array<i64: 8, 8, 128>}, {pipeline_mode = #tpu.pipeline_mode<synchronous>, transform_indices = @transform_1, window_bounds = array<i64: 32, 128>}, {transform_indices = @transform_2, window_bounds = array<i64: 8, 8, 32>}]} {
    %c0_i32 = arith.constant 0 : i32
    %0 = arith.cmpi eq, %arg0, %c0_i32 : i32
    %1 = arith.extui %0 : i1 to i32
    %c0_i32_0 = arith.constant 0 : i32
    %2 = arith.cmpi ne, %1, %c0_i32_0 : i32
    scf.if %2 {
      %cst_82 = arith.constant 0.000000e+00 : f32
      %288 = vector.broadcast %cst_82 : f32 to vector<8x32xf32>
      %c0_83 = arith.constant 0 : index
      %c0_84 = arith.constant 0 : index
      %289 = vector.load %arg4[%c0_83, %c0_84] : memref<8x32xf32, #tpu.memory_space<vmem>>, vector<8x32xf32>
      tpu.vector_store %arg4[%c0_83, %c0_84], %288 {strides = array<i32>} : memref<8x32xf32, #tpu.memory_space<vmem>>, vector<8x32xf32>,
      %cst_85 = arith.constant 0.000000e+00 : f32
      %290 = vector.broadcast %cst_85 : f32 to vector<8x32xf32>
      %c0_86 = arith.constant 0 : index
      %c0_87 = arith.constant 0 : index
      %291 = vector.load %arg5[%c0_86, %c0_87] : memref<8x32xf32, #tpu.memory_space<vmem>>, vector<8x32xf32>
      tpu.vector_store %arg5[%c0_86, %c0_87], %290 {strides = array<i32>} : memref<8x32xf32, #tpu.memory_space<vmem>>, vector<8x32xf32>,
    } else {
    }
    %c0 = arith.constant 0 : index
    %c0_1 = arith.constant 0 : index
    %3 = vector.load %arg4[%c0, %c0_1] : memref<8x32xf32, #tpu.memory_space<vmem>>, vector<8x32xf32>
    %c0_2 = arith.constant 0 : index
    %c0_3 = arith.constant 0 : index
    %4 = vector.load %arg5[%c0_2, %c0_3] : memref<8x32xf32, #tpu.memory_space<vmem>>, vector<8x32xf32>
    %c0_4 = arith.constant 0 : index
    %c0_5 = arith.constant 0 : index
    %5 = vector.load %arg2[%c0_4, %c0_5] : memref<32x128xbf16, #tpu.memory_space<vmem>>, vector<32x128xbf16>
    %c0_6 = arith.constant 0 : index
    %c0_7 = arith.constant 0 : index
    %c0_8 = arith.constant 0 : index
    %6 = vector.load %arg1[%c0_6, %c0_7, %c0_8] : memref<8x8x128xbf16, #tpu.memory_space<vmem>>, vector<1x8x128xbf16>
    %7 = vector.shape_cast %6 : vector<1x8x128xbf16> to vector<8x128xbf16>
    %8 = arith.extf %7 : vector<8x128xbf16> to vector<8x128xf32>
    %9 = arith.truncf %3 : vector<8x32xf32> to vector<8x32xbf16>
    %cst = arith.constant dense<0.000000e+00> : vector<8x128xf32>
    %10 = tpu.matmul %9, %5, %cst {dimension_numbers = #tpu.dot_dimension_numbers<[1], [0], [0], [1], [0, 0, 1, 1], [], []>} : vector<8x32xbf16>, vector<32x128xbf16>, vector<8x128xf32> -> vector<8x128xf32>
    %11 = arith.addf %8, %10 : vector<8x128xf32>
    %12 = vector.extract_strided_slice %11 {offsets = [0, 0], sizes = [8, 32], strides = [1, 1]} : vector<8x128xf32> to vector<8x32xf32>
    %13 = arith.negf %12 : vector<8x32xf32>
    %14 = math.exp %13 : vector<8x32xf32>
    %cst_9 = arith.constant 1.000000e+00 : f32
    %15 = vector.broadcast %cst_9 : f32 to vector<8x32xf32>
    %16 = arith.addf %15, %14 : vector<8x32xf32>
    %17 = arith.divf %15, %16 : vector<8x32xf32>
    %18 = vector.extract_strided_slice %11 {offsets = [0, 32], sizes = [8, 32], strides = [1, 1]} : vector<8x128xf32> to vector<8x32xf32>
    %19 = arith.negf %18 : vector<8x32xf32>
    %20 = math.exp %19 : vector<8x32xf32>
    %cst_10 = arith.constant 1.000000e+00 : f32
    %21 = vector.broadcast %cst_10 : f32 to vector<8x32xf32>
    %22 = arith.addf %21, %20 : vector<8x32xf32>
    %23 = arith.divf %21, %22 : vector<8x32xf32>
    %24 = vector.extract_strided_slice %11 {offsets = [0, 64], sizes = [8, 32], strides = [1, 1]} : vector<8x128xf32> to vector<8x32xf32>
    %25 = math.tanh %24 : vector<8x32xf32>
    %26 = vector.extract_strided_slice %11 {offsets = [0, 96], sizes = [8, 32], strides = [1, 1]} : vector<8x128xf32> to vector<8x32xf32>
    %27 = arith.negf %26 : vector<8x32xf32>
    %28 = math.exp %27 : vector<8x32xf32>
    %cst_11 = arith.constant 1.000000e+00 : f32
    %29 = vector.broadcast %cst_11 : f32 to vector<8x32xf32>
    %30 = arith.addf %29, %28 : vector<8x32xf32>
    %31 = arith.divf %29, %30 : vector<8x32xf32>
    %32 = arith.mulf %23, %4 : vector<8x32xf32>
    %33 = arith.mulf %17, %25 : vector<8x32xf32>
    %34 = arith.addf %32, %33 : vector<8x32xf32>
    %35 = math.tanh %34 : vector<8x32xf32>
    %36 = arith.mulf %31, %35 : vector<8x32xf32>
    %37 = arith.truncf %36 : vector<8x32xf32> to vector<8x32xbf16>
    %c0_12 = arith.constant 0 : index
    %c0_13 = arith.constant 0 : index
    %c0_14 = arith.constant 0 : index
    %38 = vector.load %arg3[%c0_12, %c0_13, %c0_14] : memref<8x8x32xbf16, #tpu.memory_space<vmem>>, vector<1x8x32xbf16>
    %39 = vector.shape_cast %38 : vector<1x8x32xbf16> to vector<8x32xbf16>
    %40 = vector.shape_cast %37 : vector<8x32xbf16> to vector<1x8x32xbf16>
    tpu.vector_store %arg3[%c0_12, %c0_13, %c0_14], %40 {strides = array<i32>} : memref<8x8x32xbf16, #tpu.memory_space<vmem>>, vector<1x8x32xbf16>,
    %c1 = arith.constant 1 : index
    %c0_15 = arith.constant 0 : index
    %c0_16 = arith.constant 0 : index
    %41 = vector.load %arg1[%c1, %c0_15, %c0_16] : memref<8x8x128xbf16, #tpu.memory_space<vmem>>, vector<1x8x128xbf16>
    %42 = vector.shape_cast %41 : vector<1x8x128xbf16> to vector<8x128xbf16>
    %43 = arith.extf %42 : vector<8x128xbf16> to vector<8x128xf32>
    %44 = arith.truncf %36 : vector<8x32xf32> to vector<8x32xbf16>
    %cst_17 = arith.constant dense<0.000000e+00> : vector<8x128xf32>
    %45 = tpu.matmul %44, %5, %cst_17 {dimension_numbers = #tpu.dot_dimension_numbers<[1], [0], [0], [1], [0, 0, 1, 1], [], []>} : vector<8x32xbf16>, vector<32x128xbf16>, vector<8x128xf32> -> vector<8x128xf32>
    %46 = arith.addf %43, %45 : vector<8x128xf32>
    %47 = vector.extract_strided_slice %46 {offsets = [0, 0], sizes = [8, 32], strides = [1, 1]} : vector<8x128xf32> to vector<8x32xf32>
    %48 = arith.negf %47 : vector<8x32xf32>
    %49 = math.exp %48 : vector<8x32xf32>
    %cst_18 = arith.constant 1.000000e+00 : f32
    %50 = vector.broadcast %cst_18 : f32 to vector<8x32xf32>
    %51 = arith.addf %50, %49 : vector<8x32xf32>
    %52 = arith.divf %50, %51 : vector<8x32xf32>
    %53 = vector.extract_strided_slice %46 {offsets = [0, 32], sizes = [8, 32], strides = [1, 1]} : vector<8x128xf32> to vector<8x32xf32>
    %54 = arith.negf %53 : vector<8x32xf32>
    %55 = math.exp %54 : vector<8x32xf32>
    %cst_19 = arith.constant 1.000000e+00 : f32
    %56 = vector.broadcast %cst_19 : f32 to vector<8x32xf32>
    %57 = arith.addf %56, %55 : vector<8x32xf32>
    %58 = arith.divf %56, %57 : vector<8x32xf32>
    %59 = vector.extract_strided_slice %46 {offsets = [0, 64], sizes = [8, 32], strides = [1, 1]} : vector<8x128xf32> to vector<8x32xf32>
    %60 = math.tanh %59 : vector<8x32xf32>
    %61 = vector.extract_strided_slice %46 {offsets = [0, 96], sizes = [8, 32], strides = [1, 1]} : vector<8x128xf32> to vector<8x32xf32>
    %62 = arith.negf %61 : vector<8x32xf32>
    %63 = math.exp %62 : vector<8x32xf32>
    %cst_20 = arith.constant 1.000000e+00 : f32
    %64 = vector.broadcast %cst_20 : f32 to vector<8x32xf32>
    %65 = arith.addf %64, %63 : vector<8x32xf32>
    %66 = arith.divf %64, %65 : vector<8x32xf32>
    %67 = arith.mulf %58, %34 : vector<8x32xf32>
    %68 = arith.mulf %52, %60 : vector<8x32xf32>
    %69 = arith.addf %67, %68 : vector<8x32xf32>
    %70 = math.tanh %69 : vector<8x32xf32>
    %71 = arith.mulf %66, %70 : vector<8x32xf32>
    %72 = arith.truncf %71 : vector<8x32xf32> to vector<8x32xbf16>
    %c1_21 = arith.constant 1 : index
    %c0_22 = arith.constant 0 : index
    %c0_23 = arith.constant 0 : index
    %73 = vector.load %arg3[%c1_21, %c0_22, %c0_23] : memref<8x8x32xbf16, #tpu.memory_space<vmem>>, vector<1x8x32xbf16>
    %74 = vector.shape_cast %73 : vector<1x8x32xbf16> to vector<8x32xbf16>
    %75 = vector.shape_cast %72 : vector<8x32xbf16> to vector<1x8x32xbf16>
    tpu.vector_store %arg3[%c1_21, %c0_22, %c0_23], %75 {strides = array<i32>} : memref<8x8x32xbf16, #tpu.memory_space<vmem>>, vector<1x8x32xbf16>,
    %c2 = arith.constant 2 : index
    %c0_24 = arith.constant 0 : index
    %c0_25 = arith.constant 0 : index
    %76 = vector.load %arg1[%c2, %c0_24, %c0_25] : memref<8x8x128xbf16, #tpu.memory_space<vmem>>, vector<1x8x128xbf16>
    %77 = vector.shape_cast %76 : vector<1x8x128xbf16> to vector<8x128xbf16>
    %78 = arith.extf %77 : vector<8x128xbf16> to vector<8x128xf32>
    %79 = arith.truncf %71 : vector<8x32xf32> to vector<8x32xbf16>
    %cst_26 = arith.constant dense<0.000000e+00> : vector<8x128xf32>
    %80 = tpu.matmul %79, %5, %cst_26 {dimension_numbers = #tpu.dot_dimension_numbers<[1], [0], [0], [1], [0, 0, 1, 1], [], []>} : vector<8x32xbf16>, vector<32x128xbf16>, vector<8x128xf32> -> vector<8x128xf32>
    %81 = arith.addf %78, %80 : vector<8x128xf32>
    %82 = vector.extract_strided_slice %81 {offsets = [0, 0], sizes = [8, 32], strides = [1, 1]} : vector<8x128xf32> to vector<8x32xf32>
    %83 = arith.negf %82 : vector<8x32xf32>
    %84 = math.exp %83 : vector<8x32xf32>
    %cst_27 = arith.constant 1.000000e+00 : f32
    %85 = vector.broadcast %cst_27 : f32 to vector<8x32xf32>
    %86 = arith.addf %85, %84 : vector<8x32xf32>
    %87 = arith.divf %85, %86 : vector<8x32xf32>
    %88 = vector.extract_strided_slice %81 {offsets = [0, 32], sizes = [8, 32], strides = [1, 1]} : vector<8x128xf32> to vector<8x32xf32>
    %89 = arith.negf %88 : vector<8x32xf32>
    %90 = math.exp %89 : vector<8x32xf32>
    %cst_28 = arith.constant 1.000000e+00 : f32
    %91 = vector.broadcast %cst_28 : f32 to vector<8x32xf32>
    %92 = arith.addf %91, %90 : vector<8x32xf32>
    %93 = arith.divf %91, %92 : vector<8x32xf32>
    %94 = vector.extract_strided_slice %81 {offsets = [0, 64], sizes = [8, 32], strides = [1, 1]} : vector<8x128xf32> to vector<8x32xf32>
    %95 = math.tanh %94 : vector<8x32xf32>
    %96 = vector.extract_strided_slice %81 {offsets = [0, 96], sizes = [8, 32], strides = [1, 1]} : vector<8x128xf32> to vector<8x32xf32>
    %97 = arith.negf %96 : vector<8x32xf32>
    %98 = math.exp %97 : vector<8x32xf32>
    %cst_29 = arith.constant 1.000000e+00 : f32
    %99 = vector.broadcast %cst_29 : f32 to vector<8x32xf32>
    %100 = arith.addf %99, %98 : vector<8x32xf32>
    %101 = arith.divf %99, %100 : vector<8x32xf32>
    %102 = arith.mulf %93, %69 : vector<8x32xf32>
    %103 = arith.mulf %87, %95 : vector<8x32xf32>
    %104 = arith.addf %102, %103 : vector<8x32xf32>
    %105 = math.tanh %104 : vector<8x32xf32>
    %106 = arith.mulf %101, %105 : vector<8x32xf32>
    %107 = arith.truncf %106 : vector<8x32xf32> to vector<8x32xbf16>
    %c2_30 = arith.constant 2 : index
    %c0_31 = arith.constant 0 : index
    %c0_32 = arith.constant 0 : index
    %108 = vector.load %arg3[%c2_30, %c0_31, %c0_32] : memref<8x8x32xbf16, #tpu.memory_space<vmem>>, vector<1x8x32xbf16>
    %109 = vector.shape_cast %108 : vector<1x8x32xbf16> to vector<8x32xbf16>
    %110 = vector.shape_cast %107 : vector<8x32xbf16> to vector<1x8x32xbf16>
    tpu.vector_store %arg3[%c2_30, %c0_31, %c0_32], %110 {strides = array<i32>} : memref<8x8x32xbf16, #tpu.memory_space<vmem>>, vector<1x8x32xbf16>,
    %c3 = arith.constant 3 : index
    %c0_33 = arith.constant 0 : index
    %c0_34 = arith.constant 0 : index
    %111 = vector.load %arg1[%c3, %c0_33, %c0_34] : memref<8x8x128xbf16, #tpu.memory_space<vmem>>, vector<1x8x128xbf16>
    %112 = vector.shape_cast %111 : vector<1x8x128xbf16> to vector<8x128xbf16>
    %113 = arith.extf %112 : vector<8x128xbf16> to vector<8x128xf32>
    %114 = arith.truncf %106 : vector<8x32xf32> to vector<8x32xbf16>
    %cst_35 = arith.constant dense<0.000000e+00> : vector<8x128xf32>
    %115 = tpu.matmul %114, %5, %cst_35 {dimension_numbers = #tpu.dot_dimension_numbers<[1], [0], [0], [1], [0, 0, 1, 1], [], []>} : vector<8x32xbf16>, vector<32x128xbf16>, vector<8x128xf32> -> vector<8x128xf32>
    %116 = arith.addf %113, %115 : vector<8x128xf32>
    %117 = vector.extract_strided_slice %116 {offsets = [0, 0], sizes = [8, 32], strides = [1, 1]} : vector<8x128xf32> to vector<8x32xf32>
    %118 = arith.negf %117 : vector<8x32xf32>
    %119 = math.exp %118 : vector<8x32xf32>
    %cst_36 = arith.constant 1.000000e+00 : f32
    %120 = vector.broadcast %cst_36 : f32 to vector<8x32xf32>
    %121 = arith.addf %120, %119 : vector<8x32xf32>
    %122 = arith.divf %120, %121 : vector<8x32xf32>
    %123 = vector.extract_strided_slice %116 {offsets = [0, 32], sizes = [8, 32], strides = [1, 1]} : vector<8x128xf32> to vector<8x32xf32>
    %124 = arith.negf %123 : vector<8x32xf32>
    %125 = math.exp %124 : vector<8x32xf32>
    %cst_37 = arith.constant 1.000000e+00 : f32
    %126 = vector.broadcast %cst_37 : f32 to vector<8x32xf32>
    %127 = arith.addf %126, %125 : vector<8x32xf32>
    %128 = arith.divf %126, %127 : vector<8x32xf32>
    %129 = vector.extract_strided_slice %116 {offsets = [0, 64], sizes = [8, 32], strides = [1, 1]} : vector<8x128xf32> to vector<8x32xf32>
    %130 = math.tanh %129 : vector<8x32xf32>
    %131 = vector.extract_strided_slice %116 {offsets = [0, 96], sizes = [8, 32], strides = [1, 1]} : vector<8x128xf32> to vector<8x32xf32>
    %132 = arith.negf %131 : vector<8x32xf32>
    %133 = math.exp %132 : vector<8x32xf32>
    %cst_38 = arith.constant 1.000000e+00 : f32
    %134 = vector.broadcast %cst_38 : f32 to vector<8x32xf32>
    %135 = arith.addf %134, %133 : vector<8x32xf32>
    %136 = arith.divf %134, %135 : vector<8x32xf32>
    %137 = arith.mulf %128, %104 : vector<8x32xf32>
    %138 = arith.mulf %122, %130 : vector<8x32xf32>
    %139 = arith.addf %137, %138 : vector<8x32xf32>
    %140 = math.tanh %139 : vector<8x32xf32>
    %141 = arith.mulf %136, %140 : vector<8x32xf32>
    %142 = arith.truncf %141 : vector<8x32xf32> to vector<8x32xbf16>
    %c3_39 = arith.constant 3 : index
    %c0_40 = arith.constant 0 : index
    %c0_41 = arith.constant 0 : index
    %143 = vector.load %arg3[%c3_39, %c0_40, %c0_41] : memref<8x8x32xbf16, #tpu.memory_space<vmem>>, vector<1x8x32xbf16>
    %144 = vector.shape_cast %143 : vector<1x8x32xbf16> to vector<8x32xbf16>
    %145 = vector.shape_cast %142 : vector<8x32xbf16> to vector<1x8x32xbf16>
    tpu.vector_store %arg3[%c3_39, %c0_40, %c0_41], %145 {strides = array<i32>} : memref<8x8x32xbf16, #tpu.memory_space<vmem>>, vector<1x8x32xbf16>,
    %c4 = arith.constant 4 : index
    %c0_42 = arith.constant 0 : index
    %c0_43 = arith.constant 0 : index
    %146 = vector.load %arg1[%c4, %c0_42, %c0_43] : memref<8x8x128xbf16, #tpu.memory_space<vmem>>, vector<1x8x128xbf16>
    %147 = vector.shape_cast %146 : vector<1x8x128xbf16> to vector<8x128xbf16>
    %148 = arith.extf %147 : vector<8x128xbf16> to vector<8x128xf32>
    %149 = arith.truncf %141 : vector<8x32xf32> to vector<8x32xbf16>
    %cst_44 = arith.constant dense<0.000000e+00> : vector<8x128xf32>
    %150 = tpu.matmul %149, %5, %cst_44 {dimension_numbers = #tpu.dot_dimension_numbers<[1], [0], [0], [1], [0, 0, 1, 1], [], []>} : vector<8x32xbf16>, vector<32x128xbf16>, vector<8x128xf32> -> vector<8x128xf32>
    %151 = arith.addf %148, %150 : vector<8x128xf32>
    %152 = vector.extract_strided_slice %151 {offsets = [0, 0], sizes = [8, 32], strides = [1, 1]} : vector<8x128xf32> to vector<8x32xf32>
    %153 = arith.negf %152 : vector<8x32xf32>
    %154 = math.exp %153 : vector<8x32xf32>
    %cst_45 = arith.constant 1.000000e+00 : f32
    %155 = vector.broadcast %cst_45 : f32 to vector<8x32xf32>
    %156 = arith.addf %155, %154 : vector<8x32xf32>
    %157 = arith.divf %155, %156 : vector<8x32xf32>
    %158 = vector.extract_strided_slice %151 {offsets = [0, 32], sizes = [8, 32], strides = [1, 1]} : vector<8x128xf32> to vector<8x32xf32>
    %159 = arith.negf %158 : vector<8x32xf32>
    %160 = math.exp %159 : vector<8x32xf32>
    %cst_46 = arith.constant 1.000000e+00 : f32
    %161 = vector.broadcast %cst_46 : f32 to vector<8x32xf32>
    %162 = arith.addf %161, %160 : vector<8x32xf32>
    %163 = arith.divf %161, %162 : vector<8x32xf32>
    %164 = vector.extract_strided_slice %151 {offsets = [0, 64], sizes = [8, 32], strides = [1, 1]} : vector<8x128xf32> to vector<8x32xf32>
    %165 = math.tanh %164 : vector<8x32xf32>
    %166 = vector.extract_strided_slice %151 {offsets = [0, 96], sizes = [8, 32], strides = [1, 1]} : vector<8x128xf32> to vector<8x32xf32>
    %167 = arith.negf %166 : vector<8x32xf32>
    %168 = math.exp %167 : vector<8x32xf32>
    %cst_47 = arith.constant 1.000000e+00 : f32
    %169 = vector.broadcast %cst_47 : f32 to vector<8x32xf32>
    %170 = arith.addf %169, %168 : vector<8x32xf32>
    %171 = arith.divf %169, %170 : vector<8x32xf32>
    %172 = arith.mulf %163, %139 : vector<8x32xf32>
    %173 = arith.mulf %157, %165 : vector<8x32xf32>
    %174 = arith.addf %172, %173 : vector<8x32xf32>
    %175 = math.tanh %174 : vector<8x32xf32>
    %176 = arith.mulf %171, %175 : vector<8x32xf32>
    %177 = arith.truncf %176 : vector<8x32xf32> to vector<8x32xbf16>
    %c4_48 = arith.constant 4 : index
    %c0_49 = arith.constant 0 : index
    %c0_50 = arith.constant 0 : index
    %178 = vector.load %arg3[%c4_48, %c0_49, %c0_50] : memref<8x8x32xbf16, #tpu.memory_space<vmem>>, vector<1x8x32xbf16>
    %179 = vector.shape_cast %178 : vector<1x8x32xbf16> to vector<8x32xbf16>
    %180 = vector.shape_cast %177 : vector<8x32xbf16> to vector<1x8x32xbf16>
    tpu.vector_store %arg3[%c4_48, %c0_49, %c0_50], %180 {strides = array<i32>} : memref<8x8x32xbf16, #tpu.memory_space<vmem>>, vector<1x8x32xbf16>,
    %c5 = arith.constant 5 : index
    %c0_51 = arith.constant 0 : index
    %c0_52 = arith.constant 0 : index
    %181 = vector.load %arg1[%c5, %c0_51, %c0_52] : memref<8x8x128xbf16, #tpu.memory_space<vmem>>, vector<1x8x128xbf16>
    %182 = vector.shape_cast %181 : vector<1x8x128xbf16> to vector<8x128xbf16>
    %183 = arith.extf %182 : vector<8x128xbf16> to vector<8x128xf32>
    %184 = arith.truncf %176 : vector<8x32xf32> to vector<8x32xbf16>
    %cst_53 = arith.constant dense<0.000000e+00> : vector<8x128xf32>
    %185 = tpu.matmul %184, %5, %cst_53 {dimension_numbers = #tpu.dot_dimension_numbers<[1], [0], [0], [1], [0, 0, 1, 1], [], []>} : vector<8x32xbf16>, vector<32x128xbf16>, vector<8x128xf32> -> vector<8x128xf32>
    %186 = arith.addf %183, %185 : vector<8x128xf32>
    %187 = vector.extract_strided_slice %186 {offsets = [0, 0], sizes = [8, 32], strides = [1, 1]} : vector<8x128xf32> to vector<8x32xf32>
    %188 = arith.negf %187 : vector<8x32xf32>
    %189 = math.exp %188 : vector<8x32xf32>
    %cst_54 = arith.constant 1.000000e+00 : f32
    %190 = vector.broadcast %cst_54 : f32 to vector<8x32xf32>
    %191 = arith.addf %190, %189 : vector<8x32xf32>
    %192 = arith.divf %190, %191 : vector<8x32xf32>
    %193 = vector.extract_strided_slice %186 {offsets = [0, 32], sizes = [8, 32], strides = [1, 1]} : vector<8x128xf32> to vector<8x32xf32>
    %194 = arith.negf %193 : vector<8x32xf32>
    %195 = math.exp %194 : vector<8x32xf32>
    %cst_55 = arith.constant 1.000000e+00 : f32
    %196 = vector.broadcast %cst_55 : f32 to vector<8x32xf32>
    %197 = arith.addf %196, %195 : vector<8x32xf32>
    %198 = arith.divf %196, %197 : vector<8x32xf32>
    %199 = vector.extract_strided_slice %186 {offsets = [0, 64], sizes = [8, 32], strides = [1, 1]} : vector<8x128xf32> to vector<8x32xf32>
    %200 = math.tanh %199 : vector<8x32xf32>
    %201 = vector.extract_strided_slice %186 {offsets = [0, 96], sizes = [8, 32], strides = [1, 1]} : vector<8x128xf32> to vector<8x32xf32>
    %202 = arith.negf %201 : vector<8x32xf32>
    %203 = math.exp %202 : vector<8x32xf32>
    %cst_56 = arith.constant 1.000000e+00 : f32
    %204 = vector.broadcast %cst_56 : f32 to vector<8x32xf32>
    %205 = arith.addf %204, %203 : vector<8x32xf32>
    %206 = arith.divf %204, %205 : vector<8x32xf32>
    %207 = arith.mulf %198, %174 : vector<8x32xf32>
    %208 = arith.mulf %192, %200 : vector<8x32xf32>
    %209 = arith.addf %207, %208 : vector<8x32xf32>
    %210 = math.tanh %209 : vector<8x32xf32>
    %211 = arith.mulf %206, %210 : vector<8x32xf32>
    %212 = arith.truncf %211 : vector<8x32xf32> to vector<8x32xbf16>
    %c5_57 = arith.constant 5 : index
    %c0_58 = arith.constant 0 : index
    %c0_59 = arith.constant 0 : index
    %213 = vector.load %arg3[%c5_57, %c0_58, %c0_59] : memref<8x8x32xbf16, #tpu.memory_space<vmem>>, vector<1x8x32xbf16>
    %214 = vector.shape_cast %213 : vector<1x8x32xbf16> to vector<8x32xbf16>
    %215 = vector.shape_cast %212 : vector<8x32xbf16> to vector<1x8x32xbf16>
    tpu.vector_store %arg3[%c5_57, %c0_58, %c0_59], %215 {strides = array<i32>} : memref<8x8x32xbf16, #tpu.memory_space<vmem>>, vector<1x8x32xbf16>,
    %c6 = arith.constant 6 : index
    %c0_60 = arith.constant 0 : index
    %c0_61 = arith.constant 0 : index
    %216 = vector.load %arg1[%c6, %c0_60, %c0_61] : memref<8x8x128xbf16, #tpu.memory_space<vmem>>, vector<1x8x128xbf16>
    %217 = vector.shape_cast %216 : vector<1x8x128xbf16> to vector<8x128xbf16>
    %218 = arith.extf %217 : vector<8x128xbf16> to vector<8x128xf32>
    %219 = arith.truncf %211 : vector<8x32xf32> to vector<8x32xbf16>
    %cst_62 = arith.constant dense<0.000000e+00> : vector<8x128xf32>
    %220 = tpu.matmul %219, %5, %cst_62 {dimension_numbers = #tpu.dot_dimension_numbers<[1], [0], [0], [1], [0, 0, 1, 1], [], []>} : vector<8x32xbf16>, vector<32x128xbf16>, vector<8x128xf32> -> vector<8x128xf32>
    %221 = arith.addf %218, %220 : vector<8x128xf32>
    %222 = vector.extract_strided_slice %221 {offsets = [0, 0], sizes = [8, 32], strides = [1, 1]} : vector<8x128xf32> to vector<8x32xf32>
    %223 = arith.negf %222 : vector<8x32xf32>
    %224 = math.exp %223 : vector<8x32xf32>
    %cst_63 = arith.constant 1.000000e+00 : f32
    %225 = vector.broadcast %cst_63 : f32 to vector<8x32xf32>
    %226 = arith.addf %225, %224 : vector<8x32xf32>
    %227 = arith.divf %225, %226 : vector<8x32xf32>
    %228 = vector.extract_strided_slice %221 {offsets = [0, 32], sizes = [8, 32], strides = [1, 1]} : vector<8x128xf32> to vector<8x32xf32>
    %229 = arith.negf %228 : vector<8x32xf32>
    %230 = math.exp %229 : vector<8x32xf32>
    %cst_64 = arith.constant 1.000000e+00 : f32
    %231 = vector.broadcast %cst_64 : f32 to vector<8x32xf32>
    %232 = arith.addf %231, %230 : vector<8x32xf32>
    %233 = arith.divf %231, %232 : vector<8x32xf32>
    %234 = vector.extract_strided_slice %221 {offsets = [0, 64], sizes = [8, 32], strides = [1, 1]} : vector<8x128xf32> to vector<8x32xf32>
    %235 = math.tanh %234 : vector<8x32xf32>
    %236 = vector.extract_strided_slice %221 {offsets = [0, 96], sizes = [8, 32], strides = [1, 1]} : vector<8x128xf32> to vector<8x32xf32>
    %237 = arith.negf %236 : vector<8x32xf32>
    %238 = math.exp %237 : vector<8x32xf32>
    %cst_65 = arith.constant 1.000000e+00 : f32
    %239 = vector.broadcast %cst_65 : f32 to vector<8x32xf32>
    %240 = arith.addf %239, %238 : vector<8x32xf32>
    %241 = arith.divf %239, %240 : vector<8x32xf32>
    %242 = arith.mulf %233, %209 : vector<8x32xf32>
    %243 = arith.mulf %227, %235 : vector<8x32xf32>
    %244 = arith.addf %242, %243 : vector<8x32xf32>
    %245 = math.tanh %244 : vector<8x32xf32>
    %246 = arith.mulf %241, %245 : vector<8x32xf32>
    %247 = arith.truncf %246 : vector<8x32xf32> to vector<8x32xbf16>
    %c6_66 = arith.constant 6 : index
    %c0_67 = arith.constant 0 : index
    %c0_68 = arith.constant 0 : index
    %248 = vector.load %arg3[%c6_66, %c0_67, %c0_68] : memref<8x8x32xbf16, #tpu.memory_space<vmem>>, vector<1x8x32xbf16>
    %249 = vector.shape_cast %248 : vector<1x8x32xbf16> to vector<8x32xbf16>
    %250 = vector.shape_cast %247 : vector<8x32xbf16> to vector<1x8x32xbf16>
    tpu.vector_store %arg3[%c6_66, %c0_67, %c0_68], %250 {strides = array<i32>} : memref<8x8x32xbf16, #tpu.memory_space<vmem>>, vector<1x8x32xbf16>,
    %c7 = arith.constant 7 : index
    %c0_69 = arith.constant 0 : index
    %c0_70 = arith.constant 0 : index
    %251 = vector.load %arg1[%c7, %c0_69, %c0_70] : memref<8x8x128xbf16, #tpu.memory_space<vmem>>, vector<1x8x128xbf16>
    %252 = vector.shape_cast %251 : vector<1x8x128xbf16> to vector<8x128xbf16>
    %253 = arith.extf %252 : vector<8x128xbf16> to vector<8x128xf32>
    %254 = arith.truncf %246 : vector<8x32xf32> to vector<8x32xbf16>
    %cst_71 = arith.constant dense<0.000000e+00> : vector<8x128xf32>
    %255 = tpu.matmul %254, %5, %cst_71 {dimension_numbers = #tpu.dot_dimension_numbers<[1], [0], [0], [1], [0, 0, 1, 1], [], []>} : vector<8x32xbf16>, vector<32x128xbf16>, vector<8x128xf32> -> vector<8x128xf32>
    %256 = arith.addf %253, %255 : vector<8x128xf32>
    %257 = vector.extract_strided_slice %256 {offsets = [0, 0], sizes = [8, 32], strides = [1, 1]} : vector<8x128xf32> to vector<8x32xf32>
    %258 = arith.negf %257 : vector<8x32xf32>
    %259 = math.exp %258 : vector<8x32xf32>
    %cst_72 = arith.constant 1.000000e+00 : f32
    %260 = vector.broadcast %cst_72 : f32 to vector<8x32xf32>
    %261 = arith.addf %260, %259 : vector<8x32xf32>
    %262 = arith.divf %260, %261 : vector<8x32xf32>
    %263 = vector.extract_strided_slice %256 {offsets = [0, 32], sizes = [8, 32], strides = [1, 1]} : vector<8x128xf32> to vector<8x32xf32>
    %264 = arith.negf %263 : vector<8x32xf32>
    %265 = math.exp %264 : vector<8x32xf32>
    %cst_73 = arith.constant 1.000000e+00 : f32
    %266 = vector.broadcast %cst_73 : f32 to vector<8x32xf32>
    %267 = arith.addf %266, %265 : vector<8x32xf32>
    %268 = arith.divf %266, %267 : vector<8x32xf32>
    %269 = vector.extract_strided_slice %256 {offsets = [0, 64], sizes = [8, 32], strides = [1, 1]} : vector<8x128xf32> to vector<8x32xf32>
    %270 = math.tanh %269 : vector<8x32xf32>
    %271 = vector.extract_strided_slice %256 {offsets = [0, 96], sizes = [8, 32], strides = [1, 1]} : vector<8x128xf32> to vector<8x32xf32>
    %272 = arith.negf %271 : vector<8x32xf32>
    %273 = math.exp %272 : vector<8x32xf32>
    %cst_74 = arith.constant 1.000000e+00 : f32
    %274 = vector.broadcast %cst_74 : f32 to vector<8x32xf32>
    %275 = arith.addf %274, %273 : vector<8x32xf32>
    %276 = arith.divf %274, %275 : vector<8x32xf32>
    %277 = arith.mulf %268, %244 : vector<8x32xf32>
    %278 = arith.mulf %262, %270 : vector<8x32xf32>
    %279 = arith.addf %277, %278 : vector<8x32xf32>
    %280 = math.tanh %279 : vector<8x32xf32>
    %281 = arith.mulf %276, %280 : vector<8x32xf32>
    %282 = arith.truncf %281 : vector<8x32xf32> to vector<8x32xbf16>
    %c7_75 = arith.constant 7 : index
    %c0_76 = arith.constant 0 : index
    %c0_77 = arith.constant 0 : index
    %283 = vector.load %arg3[%c7_75, %c0_76, %c0_77] : memref<8x8x32xbf16, #tpu.memory_space<vmem>>, vector<1x8x32xbf16>
    %284 = vector.shape_cast %283 : vector<1x8x32xbf16> to vector<8x32xbf16>
    %285 = vector.shape_cast %282 : vector<8x32xbf16> to vector<1x8x32xbf16>
    tpu.vector_store %arg3[%c7_75, %c0_76, %c0_77], %285 {strides = array<i32>} : memref<8x8x32xbf16, #tpu.memory_space<vmem>>, vector<1x8x32xbf16>,
    %c0_78 = arith.constant 0 : index
    %c0_79 = arith.constant 0 : index
    %286 = vector.load %arg4[%c0_78, %c0_79] : memref<8x32xf32, #tpu.memory_space<vmem>>, vector<8x32xf32>
    tpu.vector_store %arg4[%c0_78, %c0_79], %281 {strides = array<i32>} : memref<8x32xf32, #tpu.memory_space<vmem>>, vector<8x32xf32>,
    %c0_80 = arith.constant 0 : index
    %c0_81 = arith.constant 0 : index
    %287 = vector.load %arg5[%c0_80, %c0_81] : memref<8x32xf32, #tpu.memory_space<vmem>>, vector<8x32xf32>
    tpu.vector_store %arg5[%c0_80, %c0_81], %279 {strides = array<i32>} : memref<8x32xf32, #tpu.memory_space<vmem>>, vector<8x32xf32>,
    return
  }
  func.func @transform_0(%arg0: i32) -> (i32, i32, i32) {
    %c0_i32 = arith.constant 0 : i32
    %c0_i32_0 = arith.constant 0 : i32
    %c0_i32_1 = arith.constant 0 : i32
    return %arg0, %c0_i32, %c0_i32_0 : i32, i32, i32
  }
  func.func @transform_1(%arg0: i32) -> (i32, i32) {
    %c0_i32 = arith.constant 0 : i32
    %c0_i32_0 = arith.constant 0 : i32
    %c0_i32_1 = arith.constant 0 : i32
    return %c0_i32, %c0_i32_0 : i32, i32
  }
  func.func @transform_2(%arg0: i32) -> (i32, i32, i32) {
    %c0_i32 = arith.constant 0 : i32
    %c0_i32_0 = arith.constant 0 : i32
    %c0_i32_1 = arith.constant 0 : i32
    return %arg0, %c0_i32, %c0_i32_0 : i32, i32, i32
  }
}

module attributes {stable_mosaic.version = 11 : i64} {
  func.func @_linear_kernel(%arg0: i32, %arg1: i32, %arg2: memref<8x32xbf16, #tpu.memory_space<vmem>>, %arg3: memref<32x24xbf16, #tpu.memory_space<vmem>>, %arg4: memref<1x24xf32, #tpu.memory_space<vmem>>, %arg5: memref<8x24xf32, #tpu.memory_space<vmem>>) attributes {dimension_semantics = [#tpu.dimension_semantics<parallel>, #tpu.dimension_semantics<parallel>], iteration_bounds = array<i64: 1, 1>, scalar_prefetch = 0 : i64, scratch_operands = 0 : i64, tpu.core_type = #tpu.core_type<tc>, window_params = [{transform_indices = @transform_0, window_bounds = array<i64: 8, 32>}, {transform_indices = @transform_1, window_bounds = array<i64: 32, 24>}, {transform_indices = @transform_2, window_bounds = array<i64: 1, 24>}, {transform_indices = @transform_3, window_bounds = array<i64: 8, 24>}]} {
    %c0 = arith.constant 0 : index
    %c0_0 = arith.constant 0 : index
    %0 = vector.load %arg2[%c0, %c0_0] : memref<8x32xbf16, #tpu.memory_space<vmem>>, vector<8x32xbf16>
    %c0_1 = arith.constant 0 : index
    %c0_2 = arith.constant 0 : index
    %1 = vector.load %arg3[%c0_1, %c0_2] : memref<32x24xbf16, #tpu.memory_space<vmem>>, vector<32x24xbf16>
    %cst = arith.constant dense<0.000000e+00> : vector<8x24xf32>
    %2 = tpu.matmul %0, %1, %cst {dimension_numbers = #tpu.dot_dimension_numbers<[1], [0], [0], [1], [0, 0, 1, 1], [], []>} : vector<8x32xbf16>, vector<32x24xbf16>, vector<8x24xf32> -> vector<8x24xf32>
    %c0_3 = arith.constant 0 : index
    %c0_4 = arith.constant 0 : index
    %3 = vector.load %arg4[%c0_3, %c0_4] : memref<1x24xf32, #tpu.memory_space<vmem>>, vector<1x24xf32>
    %4 = vector.broadcast %3 : vector<1x24xf32> to vector<8x24xf32>
    %5 = arith.addf %2, %4 : vector<8x24xf32>
    %c0_5 = arith.constant 0 : index
    %c0_6 = arith.constant 0 : index
    %6 = vector.load %arg5[%c0_5, %c0_6] : memref<8x24xf32, #tpu.memory_space<vmem>>, vector<8x24xf32>
    tpu.vector_store %arg5[%c0_5, %c0_6], %5 {strides = array<i32>} : memref<8x24xf32, #tpu.memory_space<vmem>>, vector<8x24xf32>,
    return
  }
  func.func @transform_0(%arg0: i32, %arg1: i32) -> (i32, i32) {
    %c0_i32 = arith.constant 0 : i32
    %c0_i32_0 = arith.constant 0 : i32
    return %arg0, %c0_i32 : i32, i32
  }
  func.func @transform_1(%arg0: i32, %arg1: i32) -> (i32, i32) {
    %c0_i32 = arith.constant 0 : i32
    %c0_i32_0 = arith.constant 0 : i32
    return %c0_i32, %arg1 : i32, i32
  }
  func.func @transform_2(%arg0: i32, %arg1: i32) -> (i32, i32) {
    %c0_i32 = arith.constant 0 : i32
    %c0_i32_0 = arith.constant 0 : i32
    return %c0_i32, %arg1 : i32, i32
  }
  func.func @transform_3(%arg0: i32, %arg1: i32) -> (i32, i32) {
    %c0_i32 = arith.constant 0 : i32
    return %arg0, %arg1 : i32, i32
  }
}

</mosaic_0001>

<bundles_post_ra>
// kernel: _lambda_.5
= control target key start
LH: loop header
LB: loop body
LE: loop exit
PB: predicated region body
PF: predicated region fallthrough
CT: control target
= control target key end

     0   :  { %s414_s1 = inlined_call_operand.vmem [shape: bf16[128,128], index: 1, kind: input, shape index: {}]   ;;  %s415_s0 = inlined_call_operand.vmem [shape: bf16[64,128], index: 0, kind: input, shape index: {}]   ;;  %s416_s2 = inlined_call_operand.vmem [shape: f32[1,128], index: 2, kind: input, shape index: {}]   ;;  %s417_s3 = inlined_call_operand.vmem [shape: bf16[64,128], index: 3, kind: output, shape index: {}]  }
   0x1   :  { %v331_v0 = vld [vmem:[%s414_s1] sm:$0xff]   ;;  %v332_v1 = vld [vmem:[%s414_s1 + $0x8] sm:$0xff]   ;;  %v333_v2 = vld [vmem:[%s414_s1 + $0x10] sm:$0xff]  }
   0x2   :  { %291 = vmatprep.subr.bf16.mxu0 %v331_v0  ;;  %315 = vmatprep.subr.bf16.mxu1 %v331_v0  ;;  %v334_v3 = vld [vmem:[%s414_s1 + $0x18] sm:$0xff]   ;;  %v339_v4 = vld [vmem:[%s415_s0] sm:$0xff]   ;;  %v340_v5 = vld [vmem:[%s415_s0 + $0x10] sm:$0xff]  }
   0x3   :  { %292 = vmatpush3.bf16.msra.mxu0 %v331_v0  ;;  %323 = vmatpush3.bf16.msra.mxu1 %v331_v0  ;;  %v335_v6 = vld [vmem:[%s414_s1 + $0x20] sm:$0xff]   ;;  %v336_v7 = vld [vmem:[%s414_s1 + $0x28] sm:$0xff]   ;;  %v337_v8 = vld [vmem:[%s414_s1 + $0x30] sm:$0xff]  }
   0x4   :  { %293 = vmatprep.subr.bf16.mxu0 %v332_v1  ;;  %316 = vmatprep.subr.bf16.mxu1 %v332_v1  ;;  %v338_v9 = vld [vmem:[%s414_s1 + $0x38] sm:$0xff]   ;;  %v341_v10 = vld [vmem:[%s415_s0 + $0x8] sm:$0xff]   ;;  %v227_v13 = vld [vmem:[%s416_s2] ss:$0 sm:$0xff] }
   0x5   :  { %307 = vmatprep.mubr.bf16.mxu0 %v339_v4  ;;  %311 = vmatprep.mubr.bf16.mxu1 %v340_v5  ;;  %v342_v11 = vld [vmem:[%s415_s0 + $0x18] sm:$0xff]  }
   0x7   :  { %294 = vmatpush3.bf16.msra.mxu0 %v332_v1  ;;  %324 = vmatpush3.bf16.msra.mxu1 %v332_v1 }
   0x8   :  { %295 = vmatprep.subr.bf16.mxu0 %v333_v2  ;;  %317 = vmatprep.subr.bf16.mxu1 %v333_v2 }
   0xb   :  { %296 = vmatpush3.bf16.msra.mxu0 %v333_v2  ;;  %325 = vmatpush3.bf16.msra.mxu1 %v333_v2 }
   0xc   :  { %297 = vmatprep.subr.bf16.mxu0 %v334_v3  ;;  %318 = vmatprep.subr.bf16.mxu1 %v334_v3 }
   0xf   :  { %298 = vmatpush3.bf16.msra.mxu0 %v334_v3  ;;  %326 = vmatpush3.bf16.msra.mxu1 %v334_v3 }
  0x10   :  { %299 = vmatprep.subr.bf16.mxu0 %v335_v6  ;;  %319 = vmatprep.subr.bf16.mxu1 %v335_v6 }
  0x13   :  { %300 = vmatpush3.bf16.msra.mxu0 %v335_v6  ;;  %327 = vmatpush3.bf16.msra.mxu1 %v335_v6 }
  0x14   :  { %301 = vmatprep.subr.bf16.mxu0 %v336_v7  ;;  %320 = vmatprep.subr.bf16.mxu1 %v336_v7 }
  0x17   :  { %302 = vmatpush3.bf16.msra.mxu0 %v336_v7  ;;  %328 = vmatpush3.bf16.msra.mxu1 %v336_v7 }
  0x18   :  { %303 = vmatprep.subr.bf16.mxu0 %v337_v8  ;;  %321 = vmatprep.subr.bf16.mxu1 %v337_v8 }
  0x1b   :  { %304 = vmatpush3.bf16.msra.mxu0 %v337_v8  ;;  %329 = vmatpush3.bf16.msra.mxu1 %v337_v8 }
  0x1c   :  { %305 = vmatprep.subr.bf16.mxu0 %v338_v9  ;;  %322 = vmatprep.subr.bf16.mxu1 %v338_v9 }
  0x1f   :  { %306 = vmatpush3.bf16.msra.mxu0 %v338_v9  ;;  %330 = vmatpush3.bf16.msra.mxu1 %v338_v9 }
  0x22   :  { %308 = vmatmul.mubr.bf16.vlgmr.msra.gmra.mrb[0].mxu0 %v341_v10  ;;  %312 = vmatmul.mubr.bf16.vlgmr.msra.gmra.mrb[0].mxu1 %v342_v11 }
  0xf5   :  { %v309_v12 = vpop.f32.mrb[0].mxu0  ;;  %v313_v14 = vpop.f32.mrb[0].mxu1 }
  0xf6   :  { %v152_v15 = vpop.f32.mrb[1].mxu0  ;;  %v168_v16 = vpop.f32.mrb[1].mxu1  ;;  %v161_v19 = vadd.f32 %v309_v12, %v227_v13  ;;  %v177_v20 = vadd.f32 %v313_v14, %v227_v13 }
  0xf7   :  { %v310_v17 = vpop.f32.mrb[2].mxu0  ;;  %v314_v18 = vpop.f32.mrb[2].mxu1  ;;  %v153_v25 = vadd.f32 %v227_v13, %v152_v15  ;;  %v169_v26 = vadd.f32 %v227_v13, %v168_v16 }
  0xf8   :  { %v164_v21 = vadd.f32 %v310_v17, %v227_v13  ;;  %v180_v22 = vadd.f32 %v314_v18, %v227_v13  ;;  %v155_v23 = vpop.f32.mrb[3].mxu0  ;;  %v171_v24 = vpop.f32.mrb[3].mxu1 }
  0xf9   :  { %v156_v27 = vadd.f32 %v227_v13, %v155_v23  ;;  %v172_v28 = vadd.f32 %v227_v13, %v171_v24 }
  0xfa   :  { %v264_v29 = vpack.c.bf16 %v164_v21, %v161_v19  ;;  %v274_v30 = vpack.c.bf16 %v180_v22, %v177_v20 }
  0xfb   :  { %v259_v31 = vpack.c.bf16 %v156_v27, %v153_v25  ;;  %v269_v32 = vpack.c.bf16 %v172_v28, %v169_v26 }
  0xfc   :  { %276 = vst [vmem:[%s417_s3 + $0x8] sm:$0xff] %v264_v29   ;;  %278 = vst [vmem:[%s417_s3 + $0x18] sm:$0xff] %v274_v30  }
  0xfd   :  { %260 = vst [vmem:[%s417_s3] sm:$0xff] %v259_v31   ;;  %277 = vst [vmem:[%s417_s3 + $0x10] sm:$0xff] %v269_v32  }

// kernel: _lambda_.4
= control target key start
LH: loop header
LB: loop body
LE: loop exit
PB: predicated region body
PF: predicated region fallthrough
CT: control target
= control target key end

     0   :  { %vm69_vm0 = vcmask 195584   ;;  %s1139_s25 = smov 120   ;;  %vm82_vm1 = vcmask 1043456   ;;  %s1142_s10 = smov 96   ;;  %v1143_v47 = vmov 0   ;;  %v36_v48 = vlaneseq  ;;  %s1375_s0 = inlined_call_operand.vmem [shape: bf16[64,56], index: 0, kind: input, shape index: {}]   ;;  %s1376_s1 = inlined_call_operand.vmem [shape: bf16[24,128], index: 1, kind: input, shape index: {}]   ;;  %s1377_s4 = inlined_call_operand.vmem [shape: bf16[128,256], index: 4, kind: input, shape index: {}]   ;;  %s1378_s2 = inlined_call_operand.vmem [shape: f32[5,128], index: 2, kind: input, shape index: {}]   ;;  %s1379_s3 = inlined_call_operand.vmem [shape: f32[1,128], index: 3, kind: input, shape index: {}]   ;;  %s1380_s5 = inlined_call_operand.vmem [shape: f32[1,256], index: 5, kind: input, shape index: {}]   ;;  %s1381_s6 = inlined_call_operand.vmem [shape: bf16[64,128], index: 6, kind: output, shape index: {}]  }
   0x1   :  { %v1061_v0 = vld [vmem:[%s1375_s0] sm:$0xff]   ;;  %v1062_v1 = vld [vmem:[%s1375_s0 + $0x8] sm:$0xff]   ;;  %v1063_v2 = vld [vmem:[%s1375_s0 + $0x10] sm:$0xff]  }
   0x2   :  { %155 = vrot.lane.b32.xlu0 %v1061_v0, %s1139_s25  ;;  %995 = vmatprep.mubr.msk.bf16.mxu0 %vm69_vm0, %v1061_v0  ;;  %v1064_v3 = vld [vmem:[%s1375_s0 + $0x18] sm:$0xff]   ;;  %v1065_v4 = vld [vmem:[%s1376_s1] sm:$0xff]   ;;  %v1066_v5 = vld [vmem:[%s1376_s1 + $0x8] ss:$0 sps:$4 sm:$0xff]   ;;  %s1140_s0 = smov 112   ;;  %s1141_s1 = smov 104  }
   0x3   :  { %159 = vrot.lane.b32.xlu1 %v1063_v2, %s1139_s25  ;;  %991 = vmatprep.subr.bf16.mxu0 %v1065_v4  ;;  %v84_v6 = vsel %vm82_vm1, %v1066_v5, 0  ;;  %v1069_v24 = vld [vmem:[%s1377_s4 + $0x4] ss:$8 sps:$4 sm:$0xff]   ;;  %v1067_v26 = vld [vmem:[%s1377_s4] ss:$8 sps:$4 sm:$0xff]   ;;  %v1272_v49 = vshrl.u32 %v36_v48, 7 }
   0x4   :  { %992 = vmatpush3.bf16.msra.mxu0 %v1065_v4  ;;  %1027 = vmatprep.subr.bf16.mxu1 %v1065_v4  ;;  %v1072_v29 = vld [vmem:[%s1377_s4 + $0x14] ss:$8 sps:$4 sm:$0xff]   ;;  %v1070_v30 = vld [vmem:[%s1377_s4 + $0x10] ss:$8 sps:$4 sm:$0xff]   ;;  %v1075_v32 = vld [vmem:[%s1377_s4 + $0x24] ss:$8 sps:$4 sm:$0xff]  }
   0x5   :  { %1051 = vmatprep.subr.msk.bf16.mxu0 %vm82_vm1, %v1066_v5  ;;  %1028 = vmatpush3.bf16.msra.mxu1 %v1065_v4  ;;  %v1073_v34 = vld [vmem:[%s1377_s4 + $0x20] ss:$8 sps:$4 sm:$0xff]   ;;  %v1078_v37 = vld [vmem:[%s1377_s4 + $0x34] ss:$8 sps:$4 sm:$0xff]   ;;  %v1076_v38 = vld [vmem:[%s1377_s4 + $0x30] ss:$8 sps:$4 sm:$0xff]  }
   0x6   :  { %157 = vrot.lane.b32.xlu0 %v1062_v1, %s1139_s25  ;;  %1054 = vmatprep.subr.msk.bf16.mxu1 %vm82_vm1, %v1066_v5  ;;  %v1081_v39 = vld [vmem:[%s1377_s4 + $0x44] ss:$8 sps:$4 sm:$0xff]   ;;  %v1079_v40 = vld [vmem:[%s1377_s4 + $0x40] ss:$8 sps:$4 sm:$0xff]   ;;  %v1084_v41 = vld [vmem:[%s1377_s4 + $0x54] ss:$8 sps:$4 sm:$0xff]  }
   0x7   :  { %161 = vrot.lane.b32.xlu1 %v1064_v3, %s1139_s25  ;;  %v1082_v42 = vld [vmem:[%s1377_s4 + $0x50] ss:$8 sps:$4 sm:$0xff]   ;;  %v1087_v43 = vld [vmem:[%s1377_s4 + $0x64] ss:$8 sps:$4 sm:$0xff]   ;;  %v1085_v44 = vld [vmem:[%s1377_s4 + $0x60] ss:$8 sps:$4 sm:$0xff]  }
   0x8   :  { %994 = vmatpush3.bf16.msra.mxu0 %v84_v6  ;;  %v1090_v45 = vld [vmem:[%s1377_s4 + $0x74] ss:$8 sps:$4 sm:$0xff]   ;;  %v1088_v46 = vld [vmem:[%s1377_s4 + $0x70] ss:$8 sps:$4 sm:$0xff]   ;;  %v38_v50 = vsub.s32 0, %v1272_v49  ;;  %v153_v51 = vsub.s32 1, %v1272_v49 }
   0x9   :  { %1003 = vmatprep.subr.bf16.mxu0 %v1065_v4  ;;  %1030 = vmatpush3.bf16.msra.mxu1 %v84_v6  ;;  %v1279_v52 = vld [vmem:[%s1378_s2] sm:$0x1f] }
   0xa   :  { %252 = vrot.lane.b32.xlu0 %v1061_v0, %s1140_s0  ;;  %674 = vmatprep.subr.bf16.mxu1 %v1069_v24  ;;  %v39_v53 = vrot.slane %v1279_v52, %v38_v50  ;;  %v154_v54 = vrot.slane %v1279_v52, %v153_v51 }
   0xb   :  { %254 = vrot.lane.b32.xlu1 %v1062_v1, %s1140_s0  ;;  %996 = vmatmul.mubr.msk.bf16.vlgmr.msra.gmra.mrb[0].mxu0 %vm69_vm0, %v1062_v1 }
   0xc   :  { %1004 = vmatpush3.bf16.msra.mxu0 %v1065_v4  ;;  %999 = vmatprep.mubr.msk.bf16.mxu0 %vm69_vm0, %v1063_v2 }
   0xd   :  { %1052 = vmatprep.subr.msk.bf16.mxu0 %vm82_vm1, %v1066_v5 }
   0xe   :  { %256 = vrot.lane.b32.xlu0 %v1063_v2, %s1140_s0 }
   0xf   :  { %258 = vrot.lane.b32.xlu1 %v1064_v3, %s1140_s0 }
  0x10   :  { %1006 = vmatpush3.bf16.msra.mxu0 %v84_v6 }
  0x11   :  { %1015 = vmatprep.subr.bf16.mxu0 %v1065_v4 }
  0x12   :  { %349 = vrot.lane.b32.xlu0 %v1061_v0, %s1141_s1 }
  0x13   :  { %351 = vrot.lane.b32.xlu1 %v1062_v1, %s1141_s1  ;;  %1000 = vmatmul.mubr.msk.bf16.gmra.mrb[4].mxu0 %vm69_vm0, %v1064_v3 }
  0x16   :  { %446 = vrot.lane.b32.xlu0 %v1061_v0, %s1142_s10 }
  0x17   :  { %448 = vrot.lane.b32.xlu1 %v1062_v1, %s1142_s10 }
  0x1a   :  { %353 = vrot.lane.b32.xlu0 %v1063_v2, %s1141_s1 }
  0x1b   :  { %355 = vrot.lane.b32.xlu1 %v1064_v3, %s1141_s1 }
  0x1e   :  { %450 = vrot.lane.b32.xlu0 %v1063_v2, %s1142_s10 }
  0x1f   :  { %452 = vrot.lane.b32.xlu1 %v1064_v3, %s1142_s10 }
  0x74   :  { %v156_v7 = vpop.permute.xlu0 %155 }
  0x75   :  { %1007 = vmatprep.mubr.msk.bf16.mxu0 %vm69_vm0, %v156_v7  ;;  %v160_v8 = vpop.permute.xlu1 %159 }
  0x78   :  { %v158_v9 = vpop.permute.xlu0 %157 }
  0x79   :  { %1008 = vmatmul.mubr.msk.bf16.vlgmr.msra.gmra.mrb[8].mxu0 %vm69_vm0, %v158_v9  ;;  %v162_v10 = vpop.permute.xlu1 %161 }
  0x7a   :  { %1016 = vmatpush3.bf16.msra.mxu0 %v1065_v4  ;;  %1011 = vmatprep.mubr.msk.bf16.mxu0 %vm69_vm0, %v160_v8 }
  0x7b   :  { %1053 = vmatprep.subr.msk.bf16.mxu0 %vm82_vm1, %v1066_v5 }
  0x7c   :  { %v253_v11 = vpop.permute.xlu0 %252 }
  0x7d   :  { %v255_v12 = vpop.permute.xlu1 %254 }
  0x7e   :  { %1018 = vmatpush3.bf16.msra.mxu0 %v84_v6 }
  0x7f   :  { %1039 = vmatprep.subr.bf16.mxu0 %v1065_v4 }
  0x80   :  { %v257_v13 = vpop.permute.xlu0 %256 }
  0x81   :  { %1012 = vmatmul.mubr.msk.bf16.gmra.mrb[12].mxu0 %vm69_vm0, %v162_v10  ;;  %v259_v14 = vpop.permute.xlu1 %258 }
  0x82   :  { %1019 = vmatprep.mubr.msk.bf16.mxu0 %vm69_vm0, %v253_v11  ;;  %v250_v11 = vsub.s32 2, %v1272_v49 }
  0x84   :  { %v350_v15 = vpop.permute.xlu0 %349  ;;  %v251_v24 = vrot.slane %v1279_v52, %v250_v11 }
  0x85   :  { %1031 = vmatprep.mubr.msk.bf16.mxu1 %vm69_vm0, %v350_v15  ;;  %v352_v16 = vpop.permute.xlu1 %351 }
  0x86   :  { %1032 = vmatmul.mubr.msk.bf16.vlgmr.msra.gmra.mrb[0].mxu1 %vm69_vm0, %v352_v16 }
  0x87   :  { %675 = vmatpush1.bf16.msra.mxu1 %v1067_v26 }
  0x88   :  { %v447_v17 = vpop.permute.xlu0 %446  ;;  %676 = vmatprep.subr.bf16.mxu1 %v1072_v29 }
  0x89   :  { %1020 = vmatmul.mubr.msk.bf16.vlgmr.msra.gmra.mrb[16].mxu0 %vm69_vm0, %v255_v12  ;;  %v449_v18 = vpop.permute.xlu1 %448  ;;  %v347_v12 = vsub.s32 3, %v1272_v49 }
  0x8a   :  { %1040 = vmatpush3.bf16.msra.mxu0 %v1065_v4  ;;  %1023 = vmatprep.mubr.msk.bf16.mxu0 %vm69_vm0, %v257_v13 }
  0x8b   :  { %1055 = vmatprep.subr.msk.bf16.mxu0 %vm82_vm1, %v1066_v5  ;;  %677 = vmatpush1.bf16.msra.mxu1 %v1070_v30 }
  0x8c   :  { %v354_v19 = vpop.permute.xlu0 %353  ;;  %678 = vmatprep.subr.bf16.mxu1 %v1075_v32 }
  0x8d   :  { %1035 = vmatprep.mubr.msk.bf16.mxu1 %vm69_vm0, %v354_v19  ;;  %v356_v20 = vpop.permute.xlu1 %355 }
  0x8e   :  { %1042 = vmatpush3.bf16.msra.mxu0 %v84_v6  ;;  %1036 = vmatmul.mubr.msk.bf16.gmra.mrb[4].mxu1 %vm69_vm0, %v356_v20 }
  0x8f   :  { %679 = vmatpush1.bf16.msra.mxu1 %v1073_v34  ;;  %706 = vmatprep.mubr.bf16.mxu1 %v1143_v47 }
  0x90   :  { %v451_v21 = vpop.permute.xlu0 %450  ;;  %680 = vmatprep.subr.bf16.mxu1 %v1078_v37 }
  0x91   :  { %1024 = vmatmul.mubr.msk.bf16.gmra.mrb[20].mxu0 %vm69_vm0, %v259_v14  ;;  %v453_v22 = vpop.permute.xlu1 %452 }
  0x92   :  { %1043 = vmatprep.mubr.msk.bf16.mxu0 %vm69_vm0, %v447_v17 }
  0x93   :  { %681 = vmatpush1.bf16.msra.mxu1 %v1076_v38 }
  0x94   :  { %682 = vmatprep.subr.bf16.mxu1 %v1081_v39 }
  0x97   :  { %683 = vmatpush1.bf16.msra.mxu1 %v1079_v40 }
  0x98   :  { %684 = vmatprep.subr.bf16.mxu1 %v1084_v41 }
  0x99   :  { %1044 = vmatmul.mubr.msk.bf16.vlgmr.msra.gmra.mrb[24].mxu0 %vm69_vm0, %v449_v18 }
  0x9a   :  { %1047 = vmatprep.mubr.msk.bf16.mxu0 %vm69_vm0, %v451_v21 }
  0x9b   :  { %685 = vmatpush1.bf16.msra.mxu1 %v1082_v42 }
  0x9c   :  { %686 = vmatprep.subr.bf16.mxu1 %v1087_v43 }
  0x9f   :  { %687 = vmatpush1.bf16.msra.mxu1 %v1085_v44 }
  0xa0   :  { %688 = vmatprep.subr.bf16.mxu1 %v1090_v45 }
  0xa1   :  { %1048 = vmatmul.mubr.msk.bf16.gmra.mrb[28].mxu0 %vm69_vm0, %v453_v22 }
  0xa3   :  { %689 = vmatpush1.bf16.msra.mxu1 %v1088_v46 }
  0xde   :  { %v997_v23 = vpop.f32.mrb[0].mxu0 }
  0xdf   :  { %v120_v25 = vpop.f32.mrb[1].mxu0  ;;  %v129_v56 = vadd.f32 %v997_v23, %v39_v53 }
  0xe0   :  { %v998_v27 = vpop.f32.mrb[2].mxu0  ;;  %v121_v59 = vadd.f32 %v120_v25, %v39_v53  ;;  %v348_v25 = vrot.slane %v1279_v52, %v347_v12 }
  0xe1   :  { %v123_v28 = vpop.f32.mrb[3].mxu0  ;;  %v132_v62 = vadd.f32 %v998_v27, %v39_v53 }
  0xe2   :  { %v124_v2 = vadd.f32 %v123_v28, %v39_v53 }
  0xe6   :  { %v1001_v31 = vpop.f32.mrb[4].mxu0 }
  0xe7   :  { %v136_v33 = vpop.f32.mrb[5].mxu0  ;;  %v145_v8 = vadd.f32 %v1001_v31, %v39_v53 }
  0xe8   :  { %v1002_v35 = vpop.f32.mrb[6].mxu0  ;;  %v137_v13 = vadd.f32 %v136_v33, %v39_v53 }
  0xe9   :  { %v139_v36 = vpop.f32.mrb[7].mxu0  ;;  %v148_v16 = vadd.f32 %v1002_v35, %v39_v53 }
  0xea   :  { %v140_v20 = vadd.f32 %v139_v36, %v39_v53 }
 0x14c   :  { %v1009_v55 = vpop.f32.mrb[8].mxu0 }
 0x14d   :  { %v218_v57 = vadd.f32 %v1009_v55, %v154_v54  ;;  %v209_v58 = vpop.f32.mrb[9].mxu0 }
 0x14e   :  { %v210_v60 = vadd.f32 %v209_v58, %v154_v54  ;;  %v1010_v61 = vpop.f32.mrb[10].mxu0 }
 0x14f   :  { %v242_v63 = vmax.f32 %v129_v56, %v218_v57  ;;  %v221_v0 = vadd.f32 %v1010_v61, %v154_v54  ;;  %v212_v1 = vpop.f32.mrb[11].mxu0 }
 0x150   :  { %v240_v3 = vmax.f32 %v121_v59, %v210_v60  ;;  %v213_v4 = vadd.f32 %v212_v1, %v154_v54 }
 0x151   :  { %v243_v5 = vmax.f32 %v132_v62, %v221_v0  ;;  %v444_v0 = vsub.s32 4, %v1272_v49 }
 0x152   :  { %v241_v6 = vmax.f32 %v124_v2, %v213_v4 }
 0x154   :  { %v1013_v7 = vpop.f32.mrb[12].mxu0 }
 0x155   :  { %v234_v9 = vadd.f32 %v1013_v7, %v154_v54  ;;  %v225_v10 = vpop.f32.mrb[13].mxu0 }
 0x156   :  { %v226_v14 = vadd.f32 %v225_v10, %v154_v54  ;;  %v1014_v15 = vpop.f32.mrb[14].mxu0 }
 0x157   :  { %v246_v17 = vmax.f32 %v145_v8, %v234_v9  ;;  %v237_v18 = vadd.f32 %v1014_v15, %v154_v54  ;;  %v228_v19 = vpop.f32.mrb[15].mxu0 }
 0x158   :  { %v244_v21 = vmax.f32 %v137_v13, %v226_v14  ;;  %v229_v22 = vadd.f32 %v228_v19, %v154_v54  ;;  %v445_v13 = vrot.slane %v1279_v52, %v444_v0 }
 0x159   :  { %v247_v23 = vmax.f32 %v148_v16, %v237_v18  ;;  %v1033_v27 = vpop.f32.mrb[0].mxu1 }
 0x15a   :  { %v245_v26 = vmax.f32 %v140_v20, %v229_v22  ;;  %v403_v28 = vpop.f32.mrb[1].mxu1  ;;  %v412_v33 = vadd.f32 %v1033_v27, %v348_v25 }
 0x15b   :  { %v1034_v30 = vpop.f32.mrb[2].mxu1  ;;  %v404_v38 = vadd.f32 %v403_v28, %v348_v25 }
 0x15c   :  { %v1021_v29 = vpop.f32.mrb[16].mxu0  ;;  %v406_v34 = vpop.f32.mrb[3].mxu1  ;;  %v415_v41 = vadd.f32 %v1034_v30, %v348_v25 }
 0x15d   :  { %v315_v31 = vadd.f32 %v1021_v29, %v251_v24  ;;  %v306_v32 = vpop.f32.mrb[17].mxu0  ;;  %v407_v44 = vadd.f32 %v406_v34, %v348_v25 }
 0x15e   :  { %v307_v35 = vadd.f32 %v306_v32, %v251_v24  ;;  %v1022_v37 = vpop.f32.mrb[18].mxu0 }
 0x15f   :  { %v339_v36 = vmax.f32 %v242_v63, %v315_v31  ;;  %v318_v39 = vadd.f32 %v1022_v37, %v251_v24  ;;  %v309_v40 = vpop.f32.mrb[19].mxu0 }
 0x160   :  { %v337_v42 = vmax.f32 %v240_v3, %v307_v35  ;;  %v310_v43 = vadd.f32 %v309_v40, %v251_v24 }
 0x161   :  { %v340_v45 = vmax.f32 %v243_v5, %v318_v39  ;;  %v436_v46 = vmax.f32 %v339_v36, %v412_v33  ;;  %v1037_v54 = vpop.f32.mrb[4].mxu1 }
 0x162   :  { %v338_v48 = vmax.f32 %v241_v6, %v310_v43  ;;  %v434_v53 = vmax.f32 %v337_v42, %v404_v38  ;;  %v419_v56 = vpop.f32.mrb[5].mxu1  ;;  %v428_v62 = vadd.f32 %v1037_v54, %v348_v25 }
 0x163   :  { %v437_v55 = vmax.f32 %v340_v45, %v415_v41  ;;  %v1038_v59 = vpop.f32.mrb[6].mxu1  ;;  %v420_v3 = vadd.f32 %v419_v56, %v348_v25 }
 0x164   :  { %v435_v57 = vmax.f32 %v338_v48, %v407_v44  ;;  %v1025_v58 = vpop.f32.mrb[20].mxu0  ;;  %v422_v63 = vpop.f32.mrb[7].mxu1  ;;  %v431_v6 = vadd.f32 %v1038_v59, %v348_v25 }
 0x165   :  { %v331_v60 = vadd.f32 %v1025_v58, %v251_v24  ;;  %v322_v61 = vpop.f32.mrb[21].mxu0  ;;  %v423_v10 = vadd.f32 %v422_v63, %v348_v25 }
 0x166   :  { %v323_v1 = vadd.f32 %v322_v61, %v251_v24  ;;  %v1026_v2 = vpop.f32.mrb[22].mxu0 }
 0x167   :  { %v343_v4 = vmax.f32 %v246_v17, %v331_v60  ;;  %v334_v5 = vadd.f32 %v1026_v2, %v251_v24  ;;  %v325_v7 = vpop.f32.mrb[23].mxu0 }
 0x168   :  { %v341_v8 = vmax.f32 %v244_v21, %v323_v1  ;;  %v326_v9 = vadd.f32 %v325_v7, %v251_v24  ;;  %v897_v21 = vld [vmem:[%s1379_s3] ss:$0 sm:$0xff] }
 0x169   :  { %v344_v11 = vmax.f32 %v247_v23, %v334_v5  ;;  %v440_v12 = vmax.f32 %v343_v4, %v428_v62 }
 0x16a   :  { %v342_v14 = vmax.f32 %v245_v26, %v326_v9  ;;  %v438_v15 = vmax.f32 %v341_v8, %v420_v3  ;;  %v582_v3 = vld [vmem:[%s1380_s5] sm:$0x3] }
 0x16b   :  { %v441_v16 = vmax.f32 %v344_v11, %v431_v6  ;;  %v591_v4 = vrot.slane %v582_v3, %v153_v51 }
 0x16c   :  { %v439_v18 = vmax.f32 %v342_v14, %v423_v10  ;;  %v1045_v19 = vpop.f32.mrb[24].mxu0 }
 0x16d   :  { %v509_v20 = vadd.f32 %v1045_v19, %v445_v13  ;;  %v500_v22 = vpop.f32.mrb[25].mxu0 }
 0x16e   :  { %v501_v27 = vadd.f32 %v500_v22, %v445_v13  ;;  %v1046_v28 = vpop.f32.mrb[26].mxu0 }
 0x16f   :  { %v533_v17 = vmax.f32 %v436_v46, %v509_v20  ;;  %v512_v24 = vadd.f32 %v1046_v28, %v445_v13  ;;  %v503_v25 = vpop.f32.mrb[27].mxu0 }
 0x170   :  { %v531_v23 = vmax.f32 %v434_v53, %v501_v27  ;;  %v504_v29 = vadd.f32 %v503_v25, %v445_v13 }
 0x171   :  { %v534_v30 = vmax.f32 %v437_v55, %v512_v24  ;;  %v548_v44 = vadd.f32 %v897_v21, %v533_v17 }
 0x172   :  { %v546_v52 = vadd.f32 %v897_v21, %v531_v23  ;;  %v532_v26 = vmax.f32 %v435_v57, %v504_v29 }
 0x173   :  { %v549_v40 = vadd.f32 %v897_v21, %v534_v30 }
 0x174   :  { %v547_v31 = vadd.f32 %v897_v21, %v532_v26  ;;  %v1049_v32 = vpop.f32.mrb[28].mxu0  ;;  %1091 = vtanh.f32 %v546_v52 }
 0x175   :  { %v525_v33 = vadd.f32 %v1049_v32, %v445_v13  ;;  %v516_v34 = vpop.f32.mrb[29].mxu0 }
 0x176   :  { %1093 = vtanh.f32 %v547_v31  ;;  %v517_v35 = vadd.f32 %v516_v34, %v445_v13  ;;  %v1050_v37 = vpop.f32.mrb[30].mxu0  ;;  %v1336_v31 = vrot.slane %v582_v3, %v38_v50 }
 0x177   :  { %v537_v38 = vmax.f32 %v440_v12, %v525_v33  ;;  %v528_v36 = vadd.f32 %v1050_v37, %v445_v13  ;;  %v519_v39 = vpop.f32.mrb[31].mxu0  ;;  %1095 = vtanh.f32 %v549_v40 }
 0x178   :  { %v535_v41 = vmax.f32 %v438_v15, %v517_v35  ;;  %v520_v42 = vadd.f32 %v519_v39, %v445_v13  ;;  %1097 = vtanh.f32 %v548_v44 }
 0x179   :  { %v538_v43 = vmax.f32 %v441_v16, %v528_v36  ;;  %v552_v60 = vadd.f32 %v897_v21, %v537_v38 }
 0x17a   :  { %v536_v45 = vmax.f32 %v439_v18, %v520_v42  ;;  %v550_v55 = vadd.f32 %v897_v21, %v535_v41 }
 0x17b   :  { %v553_v58 = vadd.f32 %v897_v21, %v538_v43 }
 0x17c   :  { %v551_v53 = vadd.f32 %v897_v21, %v536_v45 }
 0x17e   :  { %v1296_v46 = vpop.eup %1091  ;;  %1099 = vtanh.f32 %v551_v53 }
 0x17f   :  { %1101 = vtanh.f32 %v550_v55 }
 0x180   :  { %v1298_v48 = vpop.eup %1093  ;;  %1103 = vtanh.f32 %v553_v58 }
 0x181   :  { %v562_v54 = vpack.c.bf16 %v1298_v48, %v1296_v46  ;;  %v1303_v56 = vpop.eup %1095  ;;  %1105 = vtanh.f32 %v552_v60 }
 0x182   :  { %v1305_v57 = vpop.eup %1097 }
 0x183   :  { %707 = vmatmul.mubr.bf16.vlgmr.msra.gmra.mrb[8].mxu1 %v562_v54  ;;  %v563_v59 = vpack.c.bf16 %v1303_v56, %v1305_v57 }
 0x184   :  { %716 = vmatprep.mubr.bf16.mxu1 %v1143_v47 }
 0x188   :  { %v1310_v61 = vpop.eup %1099 }
 0x189   :  { %v1312_v62 = vpop.eup %1101 }
 0x18a   :  { %v564_v63 = vpack.c.bf16 %v1310_v61, %v1312_v62  ;;  %v1317_v0 = vpop.eup %1103 }
 0x18b   :  { %717 = vmatmul.mubr.bf16.gmra.mrb[12].mxu1 %v563_v59  ;;  %v1319_v1 = vpop.eup %1105 }
 0x18c   :  { %726 = vmatprep.mubr.bf16.mxu1 %v1143_v47  ;;  %v565_v2 = vpack.c.bf16 %v1317_v0, %v1319_v1 }
 0x193   :  { %727 = vmatmul.mubr.bf16.gmra.mrb[16].mxu1 %v564_v63 }
 0x194   :  { %736 = vmatprep.mubr.bf16.mxu1 %v1143_v47 }
 0x19b   :  { %737 = vmatmul.mubr.bf16.gmra.mrb[20].mxu1 %v565_v2 }
 0x256   :  { %v708_v5 = vpop.f32.mrb[8].mxu1 }
 0x257   :  { %v710_v7 = vpop.f32.mrb[9].mxu1  ;;  %v709_v40 = vadd.f32 %v708_v5, %v1336_v31 }
 0x258   :  { %v711_v6 = vadd.f32 %v710_v7, %v591_v4  ;;  %v712_v8 = vpop.f32.mrb[10].mxu1 }
 0x259   :  { %v714_v47 = vpop.f32.mrb[11].mxu1  ;;  %v713_v49 = vadd.f32 %v712_v8, %v1336_v31 }
 0x25a   :  { %v914_v9 = vmul.f32 -1.442695, %v711_v6  ;;  %v715_v10 = vadd.f32 %v714_v47, %v591_v4 }
 0x25c   :  { %1107 = vpow2.f32 %v914_v9  ;;  %v915_v11 = vmul.f32 -1.442695, %v715_v10 }
 0x25e   :  { %1109 = vpow2.f32 %v915_v11  ;;  %v718_v12 = vpop.f32.mrb[12].mxu1 }
 0x25f   :  { %v720_v13 = vpop.f32.mrb[13].mxu1  ;;  %v719_v7 = vadd.f32 %v718_v12, %v1336_v31 }
 0x260   :  { %v721_v14 = vadd.f32 %v720_v13, %v591_v4  ;;  %v1328_v15 = vpop.f32.mrb[14].mxu1 }
 0x261   :  { %v724_v16 = vpop.f32.mrb[15].mxu1 }
 0x262   :  { %v916_v18 = vmul.f32 -1.442695, %v721_v14  ;;  %v725_v19 = vadd.f32 %v724_v16, %v591_v4 }
 0x264   :  { %1111 = vpow2.f32 %v916_v18  ;;  %v917_v51 = vmul.f32 -1.442695, %v725_v19 }
 0x266   :  { %v1108_v20 = vpop.eup %1107  ;;  %1113 = vpow2.f32 %v917_v51  ;;  %v1330_v22 = vpop.f32.mrb[16].mxu1 }
 0x267   :  { %v771_v27 = vadd.f32 1.0, %v1108_v20  ;;  %v730_v28 = vpop.f32.mrb[17].mxu1 }
 0x268   :  { %v1110_v17 = vpop.eup %1109  ;;  %v731_v21 = vadd.f32 %v730_v28, %v591_v4  ;;  %v1332_v24 = vpop.f32.mrb[18].mxu1 }
 0x269   :  { %1115 = vrcp.f32 %v771_v27  ;;  %v772_v25 = vadd.f32 1.0, %v1110_v17  ;;  %v734_v23 = vpop.f32.mrb[19].mxu1 }
 0x26a   :  { %v918_v29 = vmul.f32 -1.442695, %v731_v21  ;;  %v735_v30 = vadd.f32 %v734_v23, %v591_v4 }
 0x26b   :  { %1117 = vrcp.f32 %v772_v25 }
 0x26c   :  { %1119 = vpow2.f32 %v918_v29  ;;  %v919_v52 = vmul.f32 -1.442695, %v735_v30 }
 0x26e   :  { %v1112_v26 = vpop.eup %1111  ;;  %1121 = vpow2.f32 %v919_v52  ;;  %v1338_v32 = vpop.f32.mrb[20].mxu1 }
 0x26f   :  { %v773_v33 = vadd.f32 1.0, %v1112_v26  ;;  %v740_v34 = vpop.f32.mrb[21].mxu1  ;;  %v739_v26 = vadd.f32 %v1338_v32, %v1336_v31 }
 0x270   :  { %v1114_v35 = vpop.eup %1113  ;;  %v741_v37 = vadd.f32 %v740_v34, %v591_v4  ;;  %v1340_v38 = vpop.f32.mrb[22].mxu1 }
 0x271   :  { %1123 = vrcp.f32 %v773_v33  ;;  %v774_v36 = vadd.f32 1.0, %v1114_v35  ;;  %v744_v39 = vpop.f32.mrb[23].mxu1 }
 0x272   :  { %v920_v41 = vmul.f32 -1.442695, %v741_v37  ;;  %v745_v42 = vadd.f32 %v744_v39, %v591_v4  ;;  %v743_v37 = vadd.f32 %v1340_v38, %v1336_v31 }
 0x273   :  { %v1116_v43 = vpop.eup %1115  ;;  %1125 = vrcp.f32 %v774_v36 }
 0x274   :  { %v795_v50 = vmul.f32 %v1116_v43, %v709_v40  ;;  %v803_v44 = vsub.f32 1.0, %v1116_v43  ;;  %1127 = vpow2.f32 %v920_v41  ;;  %v921_v45 = vmul.f32 -1.442695, %v745_v42 }
 0x275   :  { %v1118_v53 = vpop.eup %1117 }
 0x276   :  { %v1120_v54 = vpop.eup %1119  ;;  %v811_v55 = vmul.f32 %v1296_v46, %v803_v44  ;;  %v796_v58 = vmul.f32 %v1118_v53, %v713_v49  ;;  %v804_v59 = vsub.f32 1.0, %v1118_v53  ;;  %1129 = vpow2.f32 %v921_v45 }
 0x277   :  { %v775_v60 = vadd.f32 1.0, %v1120_v54  ;;  %v723_v46 = vadd.f32 %v1328_v15, %v1336_v31  ;;  %v729_v15 = vadd.f32 %v1330_v22, %v1336_v31 }
 0x278   :  { %v1122_v63 = vpop.eup %1121  ;;  %v819_v2 = vadd.f32 %v811_v55, %v795_v50  ;;  %v812_v3 = vmul.f32 %v1298_v48, %v804_v59 }
 0x279   :  { %1131 = vrcp.f32 %v775_v60  ;;  %v776_v4 = vadd.f32 1.0, %v1122_v63 }
 0x27a   :  { %v820_v5 = vadd.f32 %v812_v3, %v796_v58 }
 0x27b   :  { %v1124_v6 = vpop.eup %1123  ;;  %1133 = vrcp.f32 %v776_v4 }
 0x27c   :  { %v941_v8 = vpack.c.bf16 %v820_v5, %v819_v2  ;;  %v797_v47 = vmul.f32 %v1124_v6, %v719_v7  ;;  %v805_v9 = vsub.f32 1.0, %v1124_v6 }
 0x27d   :  { %v1126_v10 = vpop.eup %1125 }
 0x27e   :  { %v1128_v11 = vpop.eup %1127  ;;  %942 = vst [vmem:[%s1381_s6] sm:$0xff] %v941_v8   ;;  %v813_v48 = vmul.f32 %v1305_v57, %v805_v9  ;;  %v798_v13 = vmul.f32 %v1126_v10, %v723_v46  ;;  %v806_v14 = vsub.f32 1.0, %v1126_v10  ;;  %v733_v57 = vadd.f32 %v1332_v24, %v1336_v31 }
 0x27f   :  { %v777_v16 = vadd.f32 1.0, %v1128_v11 }
 0x280   :  { %v1130_v12 = vpop.eup %1129  ;;  %v821_v18 = vadd.f32 %v813_v48, %v797_v47  ;;  %v814_v19 = vmul.f32 %v1303_v56, %v806_v14 }
 0x281   :  { %1135 = vrcp.f32 %v777_v16  ;;  %v778_v51 = vadd.f32 1.0, %v1130_v12 }
 0x282   :  { %v822_v20 = vadd.f32 %v814_v19, %v798_v13 }
 0x283   :  { %v1132_v27 = vpop.eup %1131  ;;  %1137 = vrcp.f32 %v778_v51 }
 0x284   :  { %v946_v28 = vpack.c.bf16 %v822_v20, %v821_v18  ;;  %v799_v17 = vmul.f32 %v1132_v27, %v729_v15  ;;  %v807_v21 = vsub.f32 1.0, %v1132_v27 }
 0x285   :  { %v1134_v25 = vpop.eup %1133 }
 0x286   :  { %958 = vst [vmem:[%s1381_s6 + $0x8] sm:$0xff] %v946_v28   ;;  %v815_v56 = vmul.f32 %v1312_v62, %v807_v21  ;;  %v800_v23 = vmul.f32 %v1134_v25, %v733_v57  ;;  %v808_v29 = vsub.f32 1.0, %v1134_v25 }
 0x288   :  { %v823_v30 = vadd.f32 %v815_v56, %v799_v17  ;;  %v816_v22 = vmul.f32 %v1310_v61, %v808_v29 }
 0x28a   :  { %v824_v52 = vadd.f32 %v816_v22, %v800_v23 }
 0x28b   :  { %v1136_v33 = vpop.eup %1135 }
 0x28c   :  { %v951_v34 = vpack.c.bf16 %v824_v52, %v823_v30  ;;  %v801_v35 = vmul.f32 %v1136_v33, %v739_v26  ;;  %v809_v24 = vsub.f32 1.0, %v1136_v33 }
 0x28d   :  { %v1138_v36 = vpop.eup %1137 }
 0x28e   :  { %959 = vst [vmem:[%s1381_s6 + $0x10] sm:$0xff] %v951_v34   ;;  %v817_v62 = vmul.f32 %v1319_v1, %v809_v24  ;;  %v802_v39 = vmul.f32 %v1138_v36, %v743_v37  ;;  %v810_v61 = vsub.f32 1.0, %v1138_v36 }
 0x290   :  { %v825_v40 = vadd.f32 %v817_v62, %v801_v35  ;;  %v818_v41 = vmul.f32 %v1317_v0, %v810_v61 }
 0x292   :  { %v826_v32 = vadd.f32 %v818_v41, %v802_v39 }
 0x294   :  { %v956_v42 = vpack.c.bf16 %v826_v32, %v825_v40 }
 0x296   :  { %960 = vst [vmem:[%s1381_s6 + $0x18] sm:$0xff] %v956_v42  }

// kernel: _lambda_.7
= control target key start
LH: loop header
LB: loop body
LE: loop exit
PB: predicated region body
PF: predicated region fallthrough
CT: control target
= control target key end

     0   :  { %v108_v0 = vmov 0.0   ;;  %vm109_vm0 = vmmov 0   ;;  %vm39_vm1 = vcmask 261120   ;;  %vm83_vm2 = vcmask 195584   ;;  %s145_s1 = inlined_call_operand.vmem [shape: bf16[32,24], index: 1, kind: input, shape index: {}]   ;;  %s146_s0 = inlined_call_operand.vmem [shape: bf16[8,32], index: 0, kind: input, shape index: {}]   ;;  %s147_s2 = inlined_call_operand.vmem [shape: f32[1,24], index: 2, kind: input, shape index: {}]   ;;  %s148_s3 = inlined_call_operand.vmem [shape: f32[8,24], index: 3, kind: output, shape index: {}]  }
   0x1   :  { %96 = vmatprep.subr.bf16.mxu0 %v108_v0  ;;  %v106_v1 = vld [vmem:[%s145_s1] sm:$0xff]   ;;  %100 = vmatprep.mubr.msk.bf16.mxu0 %vm109_vm0, %v108_v0  ;;  %v107_v2 = vld [vmem:[%s145_s1 + $0x8] sm:$0xff]  }
   0x2   :  { %97 = vmatpush3.bf16.msra.mxu0 %v106_v1  ;;  %v15_v3 = vld [vmem:[%s146_s0] sm:$0xf] }
   0x3   :  { %98 = vmatprep.subr.bf16.mxu0 %v108_v0  ;;  %v89_v4 = vld [vmem:[%s147_s2] ss:$0 sm:$0xff] }
   0x6   :  { %99 = vmatpush3.bf16.msra.mxu0 %v107_v2 }
   0x9   :  { %101 = vmatmul.mubr.msk.bf16.vlgmr.msra.gmra.mrb[0].mxu0 %vm39_vm1, %v15_v3 }
  0xdc   :  { %v77_v5 = vpop.f32.mrb[0].mxu0 }
  0xdd   :  { %v78_v6 = vadd.f32 %v89_v4, %v77_v5  ;;  %v102_v7 = vpop.f32.mrb[1].mxu0 }
  0xde   :  { %v80_v8 = vpop.f32.mrb[2].mxu0 }
  0xdf   :  { %84 = vst.msk [vmem:[%s148_s3] sm:$0xff] %vm83_vm2, %v78_v6  ;;  %v103_v9 = vpop.f32.mrb[3].mxu0 }

// kernel: _lambda_.6
= control target key start
LH: loop header
LB: loop body
LE: loop exit
PB: predicated region body
PF: predicated region fallthrough
CT: control target
= control target key end

     0   :  { %vm16_vm0 = vcmask 261120   ;;  %v917_v0 = vmov 0.0   ;;  %vm918_vm1 = vmmov 0   ;;  %s919_s14 = smov 64   ;;  %s920_s15 = smov 32   ;;  %vm120_vm2 = vcmask 257024   ;;  %s1118_s1 = inlined_call_operand.vmem [shape: bf16[32,128], index: 1, kind: input, shape index: {}]   ;;  %s1119_s0 = inlined_call_operand.vmem [shape: bf16[8,8,128], index: 0, kind: input, shape index: {}]   ;;  %s1120_s2 = inlined_call_operand.vmem [shape: bf16[8,8,32], index: 2, kind: output, shape index: {}]  }
   0x1   :  { %782 = vmatprep.subr.bf16.mxu0 %v917_v0  ;;  %v941_v1 = vld [vmem:[%s1118_s1] sm:$0xff]   ;;  %786 = vmatprep.mubr.msk.bf16.mxu0 %vm918_vm1, %v917_v0  ;;  %17 = vst.msk [vmem:[#allocation2] sm:$0xff] %vm16_vm0, %v917_v0  ;;  %18 = vst.msk [vmem:[#allocation3] sm:$0xff] %vm16_vm0, %v917_v0  ;;  %v956_v2 = vld [vmem:[%s1118_s1 + $0x8] sm:$0xff]   ;;  %s921_s5 = smov 96  }
   0x2   :  { %790 = vmatprep.subr.bf16.mxu1 %v917_v0  ;;  %794 = vmatprep.mubr.msk.bf16.mxu1 %vm918_vm1, %v917_v0  ;;  %v25_v5 = vld [vmem:[%s1119_s0] sm:$0xff]   ;;  %v720_v50 = vld [vmem:[%s1119_s0 + $0x8] sm:$0xff]  }
   0x3   :  { %783 = vmatpush3.bf16.msra.mxu0 %v941_v1  ;;  %791 = vmatpush3.bf16.msra.mxu1 %v941_v1  ;;  %v26_v6 = vunpack.c.l.bf16 %v25_v5  ;;  %v124_v29 = vunpack.c.h.bf16 %v25_v5  ;;  %v206_v51 = vunpack.c.l.bf16 %v720_v50 }
   0x4   :  { %784 = vmatprep.subr.bf16.mxu0 %v917_v0  ;;  %792 = vmatprep.subr.bf16.mxu1 %v917_v0 }
   0x7   :  { %785 = vmatpush3.bf16.msra.mxu0 %v956_v2  ;;  %793 = vmatpush3.bf16.msra.mxu1 %v956_v2 }
   0x8   :  { %v19_v3 = vld [vmem:[#allocation2] sm:$0xff]  ;;  %798 = vmatprep.subr.bf16.mxu0 %v917_v0  ;;  %806 = vmatprep.subr.bf16.mxu1 %v917_v0  ;;  %v20_v13 = vld [vmem:[#allocation3] sm:$0xff] }
   0x9   :  { %v27_v4 = vpack.c.bf16 %v19_v3, %v19_v3 }
   0xb   :  { %787 = vmatmul.mubr.msk.bf16.vlgmr.msra.gmra.mrb[0].mxu0 %vm16_vm0, %v27_v4 }
   0xc   :  { %799 = vmatpush3.bf16.msra.mxu0 %v941_v1  ;;  %802 = vmatprep.mubr.msk.bf16.mxu0 %vm918_vm1, %v917_v0 }
   0xd   :  { %800 = vmatprep.subr.bf16.mxu0 %v917_v0 }
  0x10   :  { %801 = vmatpush3.bf16.msra.mxu0 %v956_v2 }
  0x11   :  { %814 = vmatprep.subr.bf16.mxu0 %v917_v0 }
  0xde   :  { %v78_v7 = vpop.f32.mrb[0].mxu0 }
  0xdf   :  { %v84_v8 = vadd.f32 %v78_v7, %v26_v6  ;;  %v788_v9 = vpop.f32.mrb[1].mxu0 }
  0xe0   :  { %v81_v10 = vpop.f32.mrb[2].mxu0 }
  0xe1   :  { %853 = vtanh.f32 %v84_v8  ;;  %v789_v11 = vpop.f32.mrb[3].mxu0  ;;  %v713_v14 = vmul.f32 -1.442695, %v84_v8 }
  0xe2   :  { %v288_v11 = vunpack.c.h.bf16 %v720_v50 }
  0xe3   :  { %855 = vpow2.f32 %v713_v14 }
  0xeb   :  { %v854_v12 = vpop.eup %853 }
  0xec   :  { %98 = vrot.lane.b32.xlu0 %v854_v12, %s919_s14 }
  0xed   :  { %v856_v15 = vpop.eup %855 }
  0xee   :  { %v88_v16 = vadd.f32 1.0, %v856_v15 }
  0xf0   :  { %93 = vrot.lane.b32.xlu0 %v20_v13, %s920_s15  ;;  %857 = vrcp.f32 %v88_v16 }
  0xfa   :  { %v858_v17 = vpop.eup %857 }
 0x15e   :  { %v99_v18 = vpop.permute.xlu0 %98 }
 0x15f   :  { %v101_v19 = vmul.f32 %v858_v17, %v99_v18 }
 0x161   :  { %103 = vrot.lane.b32.xlu1 %v101_v19, %s920_s15 }
 0x162   :  { %v94_v20 = vpop.permute.xlu0 %93 }
 0x163   :  { %v96_v21 = vmul.f32 %v858_v17, %v94_v20 }
 0x1d3   :  { %v104_v22 = vpop.permute.xlu1 %103 }
 0x1d4   :  { %v106_v23 = vadd.f32 %v104_v22, %v96_v21 }
 0x1d6   :  { %859 = vtanh.f32 %v106_v23 }
 0x1e0   :  { %v860_v24 = vpop.eup %859 }
 0x1e1   :  { %109 = vrot.lane.b32.xlu1 %v860_v24, %s919_s14 }
 0x253   :  { %v110_v25 = vpop.permute.xlu1 %109 }
 0x254   :  { %v112_v26 = vmul.f32 %v858_v17, %v110_v25 }
 0x256   :  { %v979_v27 = vpack.c.bf16 %v112_v26, %v112_v26 }
 0x258   :  { %125 = vrot.lane.b32.xlu0 %v979_v27, %s920_s15 }
 0x2ca   :  { %v126_v28 = vpop.permute.xlu0 %125 }
 0x2cb   :  { %795 = vmatmul.mubr.msk.bf16.vlgmr.msra.gmra.mrb[0].mxu1 %vm16_vm0, %v126_v28 }
 0x2cc   :  { %807 = vmatpush3.bf16.msra.mxu1 %v941_v1  ;;  %810 = vmatprep.mubr.msk.bf16.mxu1 %vm918_vm1, %v917_v0 }
 0x2cd   :  { %808 = vmatprep.subr.bf16.mxu1 %v917_v0 }
 0x2d0   :  { %809 = vmatpush3.bf16.msra.mxu1 %v956_v2 }
 0x2d1   :  { %822 = vmatprep.subr.bf16.mxu1 %v917_v0 }
 0x39e   :  { %v164_v30 = vpop.f32.mrb[0].mxu1 }
 0x39f   :  { %v170_v31 = vadd.f32 %v164_v30, %v124_v29  ;;  %v796_v32 = vpop.f32.mrb[1].mxu1 }
 0x3a0   :  { %v167_v33 = vpop.f32.mrb[2].mxu1 }
 0x3a1   :  { %861 = vtanh.f32 %v170_v31  ;;  %v797_v34 = vpop.f32.mrb[3].mxu1  ;;  %v717_v36 = vmul.f32 -1.442695, %v170_v31  ;;  %v730_v33 = vld [vmem:[%s1119_s0 + $0x10] sm:$0xff]  }
 0x3a2   :  { %v370_v34 = vunpack.c.l.bf16 %v730_v33 }
 0x3a3   :  { %863 = vpow2.f32 %v717_v36 }
 0x3ab   :  { %v862_v35 = vpop.eup %861 }
 0x3ac   :  { %180 = vrot.lane.b32.xlu1 %v862_v35, %s919_s14 }
 0x3ad   :  { %v864_v37 = vpop.eup %863 }
 0x3ae   :  { %v174_v38 = vadd.f32 1.0, %v864_v37 }
 0x3b0   :  { %865 = vrcp.f32 %v174_v38 }
 0x3ba   :  { %v866_v39 = vpop.eup %865 }
 0x3bb   :  { %v178_v42 = vmul.f32 %v866_v39, %v106_v23 }
 0x41e   :  { %v181_v40 = vpop.permute.xlu1 %180 }
 0x41f   :  { %v183_v41 = vmul.f32 %v866_v39, %v181_v40 }
 0x421   :  { %185 = vrot.lane.b32.xlu0 %v183_v41, %s920_s15 }
 0x493   :  { %v186_v43 = vpop.permute.xlu0 %185 }
 0x494   :  { %v188_v44 = vadd.f32 %v186_v43, %v178_v42 }
 0x496   :  { %867 = vtanh.f32 %v188_v44 }
 0x4a0   :  { %v868_v45 = vpop.eup %867 }
 0x4a1   :  { %191 = vrot.lane.b32.xlu1 %v868_v45, %s919_s14 }
 0x513   :  { %v192_v46 = vpop.permute.xlu1 %191 }
 0x514   :  { %v194_v47 = vmul.f32 %v866_v39, %v192_v46 }
 0x516   :  { %v993_v48 = vpack.c.bf16 %v194_v47, %v194_v47 }
 0x518   :  { %207 = vrot.lane.b32.xlu0 %v993_v48, %s920_s15 }
 0x58a   :  { %v208_v49 = vpop.permute.xlu0 %207 }
 0x58b   :  { %803 = vmatmul.mubr.msk.bf16.vlgmr.msra.gmra.mrb[4].mxu0 %vm16_vm0, %v208_v49 }
 0x58c   :  { %815 = vmatpush3.bf16.msra.mxu0 %v941_v1  ;;  %818 = vmatprep.mubr.msk.bf16.mxu0 %vm918_vm1, %v917_v0 }
 0x58d   :  { %816 = vmatprep.subr.bf16.mxu0 %v917_v0 }
 0x590   :  { %817 = vmatpush3.bf16.msra.mxu0 %v956_v2 }
 0x591   :  { %830 = vmatprep.subr.bf16.mxu0 %v917_v0 }
 0x65e   :  { %v246_v52 = vpop.f32.mrb[4].mxu0 }
 0x65f   :  { %v252_v53 = vadd.f32 %v246_v52, %v206_v51  ;;  %v804_v54 = vpop.f32.mrb[5].mxu0 }
 0x660   :  { %v249_v55 = vpop.f32.mrb[6].mxu0 }
 0x661   :  { %869 = vtanh.f32 %v252_v53  ;;  %v805_v56 = vpop.f32.mrb[7].mxu0  ;;  %v722_v58 = vmul.f32 -1.442695, %v252_v53 }
 0x662   :  { %v452_v56 = vunpack.c.h.bf16 %v730_v33 }
 0x663   :  { %871 = vpow2.f32 %v722_v58 }
 0x66b   :  { %v870_v57 = vpop.eup %869 }
 0x66c   :  { %262 = vrot.lane.b32.xlu1 %v870_v57, %s919_s14 }
 0x66d   :  { %v872_v59 = vpop.eup %871 }
 0x66e   :  { %v256_v60 = vadd.f32 1.0, %v872_v59 }
 0x670   :  { %873 = vrcp.f32 %v256_v60 }
 0x67a   :  { %v874_v61 = vpop.eup %873 }
 0x67b   :  { %v260_v3 = vmul.f32 %v874_v61, %v188_v44 }
 0x6de   :  { %v263_v62 = vpop.permute.xlu1 %262 }
 0x6df   :  { %v265_v63 = vmul.f32 %v874_v61, %v263_v62 }
 0x6e1   :  { %267 = vrot.lane.b32.xlu0 %v265_v63, %s920_s15 }
 0x753   :  { %v268_v4 = vpop.permute.xlu0 %267 }
 0x754   :  { %v270_v5 = vadd.f32 %v268_v4, %v260_v3 }
 0x756   :  { %875 = vtanh.f32 %v270_v5 }
 0x760   :  { %v876_v6 = vpop.eup %875 }
 0x761   :  { %273 = vrot.lane.b32.xlu1 %v876_v6, %s919_s14 }
 0x7d3   :  { %v274_v7 = vpop.permute.xlu1 %273 }
 0x7d4   :  { %v276_v8 = vmul.f32 %v874_v61, %v274_v7 }
 0x7d6   :  { %v1010_v9 = vpack.c.bf16 %v276_v8, %v276_v8 }
 0x7d8   :  { %289 = vrot.lane.b32.xlu0 %v1010_v9, %s920_s15 }
 0x84a   :  { %v290_v10 = vpop.permute.xlu0 %289 }
 0x84b   :  { %811 = vmatmul.mubr.msk.bf16.vlgmr.msra.gmra.mrb[4].mxu1 %vm16_vm0, %v290_v10 }
 0x84c   :  { %823 = vmatpush3.bf16.msra.mxu1 %v941_v1  ;;  %826 = vmatprep.mubr.msk.bf16.mxu1 %vm918_vm1, %v917_v0 }
 0x84d   :  { %824 = vmatprep.subr.bf16.mxu1 %v917_v0 }
 0x850   :  { %825 = vmatpush3.bf16.msra.mxu1 %v956_v2 }
 0x851   :  { %838 = vmatprep.subr.bf16.mxu1 %v917_v0 }
 0x91e   :  { %v328_v12 = vpop.f32.mrb[4].mxu1 }
 0x91f   :  { %v334_v13 = vadd.f32 %v328_v12, %v288_v11  ;;  %v812_v14 = vpop.f32.mrb[5].mxu1 }
 0x920   :  { %v331_v15 = vpop.f32.mrb[6].mxu1  ;;  %v740_v14 = vld [vmem:[%s1119_s0 + $0x18] sm:$0xff]  }
 0x921   :  { %877 = vtanh.f32 %v334_v13  ;;  %v813_v16 = vpop.f32.mrb[7].mxu1  ;;  %v727_v18 = vmul.f32 -1.442695, %v334_v13  ;;  %v534_v15 = vunpack.c.l.bf16 %v740_v14 }
 0x923   :  { %879 = vpow2.f32 %v727_v18 }
 0x92b   :  { %v878_v17 = vpop.eup %877 }
 0x92c   :  { %344 = vrot.lane.b32.xlu1 %v878_v17, %s919_s14 }
 0x92d   :  { %v880_v19 = vpop.eup %879 }
 0x92e   :  { %v338_v20 = vadd.f32 1.0, %v880_v19 }
 0x930   :  { %881 = vrcp.f32 %v338_v20 }
 0x93a   :  { %v882_v21 = vpop.eup %881 }
 0x93b   :  { %v342_v24 = vmul.f32 %v882_v21, %v270_v5 }
 0x99e   :  { %v345_v22 = vpop.permute.xlu1 %344 }
 0x99f   :  { %v347_v23 = vmul.f32 %v882_v21, %v345_v22 }
 0x9a1   :  { %349 = vrot.lane.b32.xlu0 %v347_v23, %s920_s15 }
 0xa13   :  { %v350_v25 = vpop.permute.xlu0 %349 }
 0xa14   :  { %v352_v26 = vadd.f32 %v350_v25, %v342_v24 }
 0xa16   :  { %883 = vtanh.f32 %v352_v26 }
 0xa20   :  { %v884_v28 = vpop.eup %883 }
 0xa21   :  { %355 = vrot.lane.b32.xlu1 %v884_v28, %s919_s14 }
 0xa93   :  { %v356_v29 = vpop.permute.xlu1 %355 }
 0xa94   :  { %v358_v30 = vmul.f32 %v882_v21, %v356_v29 }
 0xa96   :  { %v1024_v31 = vpack.c.bf16 %v358_v30, %v358_v30 }
 0xa98   :  { %371 = vrot.lane.b32.xlu0 %v1024_v31, %s920_s15 }
 0xb0a   :  { %v372_v32 = vpop.permute.xlu0 %371 }
 0xb0b   :  { %819 = vmatmul.mubr.msk.bf16.vlgmr.msra.gmra.mrb[8].mxu0 %vm16_vm0, %v372_v32 }
 0xb0c   :  { %831 = vmatpush3.bf16.msra.mxu0 %v941_v1  ;;  %834 = vmatprep.mubr.msk.bf16.mxu0 %vm918_vm1, %v917_v0 }
 0xb0d   :  { %832 = vmatprep.subr.bf16.mxu0 %v917_v0 }
 0xb10   :  { %833 = vmatpush3.bf16.msra.mxu0 %v956_v2 }
 0xbde   :  { %v410_v35 = vpop.f32.mrb[8].mxu0 }
 0xbdf   :  { %v416_v36 = vadd.f32 %v410_v35, %v370_v34  ;;  %v820_v37 = vpop.f32.mrb[9].mxu0 }
 0xbe0   :  { %v413_v38 = vpop.f32.mrb[10].mxu0 }
 0xbe1   :  { %885 = vtanh.f32 %v416_v36  ;;  %v821_v39 = vpop.f32.mrb[11].mxu0  ;;  %v732_v41 = vmul.f32 -1.442695, %v416_v36  ;;  %v616_v38 = vunpack.c.h.bf16 %v740_v14 }
 0xbe3   :  { %887 = vpow2.f32 %v732_v41 }
 0xbeb   :  { %v886_v40 = vpop.eup %885 }
 0xbec   :  { %426 = vrot.lane.b32.xlu1 %v886_v40, %s919_s14 }
 0xbed   :  { %v888_v42 = vpop.eup %887 }
 0xbee   :  { %v420_v43 = vadd.f32 1.0, %v888_v42 }
 0xbf0   :  { %889 = vrcp.f32 %v420_v43 }
 0xbfa   :  { %v890_v44 = vpop.eup %889 }
 0xbfb   :  { %v424_v47 = vmul.f32 %v890_v44, %v352_v26 }
 0xc5e   :  { %v427_v45 = vpop.permute.xlu1 %426 }
 0xc5f   :  { %v429_v46 = vmul.f32 %v890_v44, %v427_v45 }
 0xc61   :  { %431 = vrot.lane.b32.xlu0 %v429_v46, %s920_s15 }
 0xcd3   :  { %v432_v49 = vpop.permute.xlu0 %431 }
 0xcd4   :  { %v434_v50 = vadd.f32 %v432_v49, %v424_v47 }
 0xcd6   :  { %891 = vtanh.f32 %v434_v50 }
 0xce0   :  { %v892_v51 = vpop.eup %891 }
 0xce1   :  { %437 = vrot.lane.b32.xlu1 %v892_v51, %s919_s14 }
 0xd53   :  { %v438_v52 = vpop.permute.xlu1 %437 }
 0xd54   :  { %v440_v53 = vmul.f32 %v890_v44, %v438_v52 }
 0xd56   :  { %v1040_v54 = vpack.c.bf16 %v440_v53, %v440_v53 }
 0xd58   :  { %453 = vrot.lane.b32.xlu0 %v1040_v54, %s920_s15 }
 0xdca   :  { %v454_v55 = vpop.permute.xlu0 %453 }
 0xdcb   :  { %827 = vmatmul.mubr.msk.bf16.vlgmr.msra.gmra.mrb[8].mxu1 %vm16_vm0, %v454_v55 }
 0xdcc   :  { %839 = vmatpush3.bf16.msra.mxu1 %v941_v1  ;;  %842 = vmatprep.mubr.msk.bf16.mxu1 %vm918_vm1, %v917_v0 }
 0xdcd   :  { %840 = vmatprep.subr.bf16.mxu1 %v917_v0 }
 0xdd0   :  { %841 = vmatpush3.bf16.msra.mxu1 %v956_v2 }
 0xe9e   :  { %v492_v57 = vpop.f32.mrb[8].mxu1 }
 0xe9f   :  { %v498_v58 = vadd.f32 %v492_v57, %v452_v56  ;;  %v828_v59 = vpop.f32.mrb[9].mxu1 }
 0xea0   :  { %v495_v60 = vpop.f32.mrb[10].mxu1 }
 0xea1   :  { %893 = vtanh.f32 %v498_v58  ;;  %v829_v61 = vpop.f32.mrb[11].mxu1  ;;  %v737_v63 = vmul.f32 -1.442695, %v498_v58 }
 0xea3   :  { %895 = vpow2.f32 %v737_v63 }
 0xeab   :  { %v894_v62 = vpop.eup %893 }
 0xeac   :  { %508 = vrot.lane.b32.xlu1 %v894_v62, %s919_s14 }
 0xead   :  { %v896_v1 = vpop.eup %895 }
 0xeae   :  { %v502_v3 = vadd.f32 1.0, %v896_v1 }
 0xeb0   :  { %897 = vrcp.f32 %v502_v3 }
 0xeba   :  { %v898_v4 = vpop.eup %897 }
 0xebb   :  { %v506_v2 = vmul.f32 %v898_v4, %v434_v50 }
 0xf1e   :  { %v509_v5 = vpop.permute.xlu1 %508 }
 0xf1f   :  { %v511_v0 = vmul.f32 %v898_v4, %v509_v5 }
 0xf21   :  { %513 = vrot.lane.b32.xlu0 %v511_v0, %s920_s15 }
 0xf93   :  { %v514_v6 = vpop.permute.xlu0 %513 }
 0xf94   :  { %v516_v7 = vadd.f32 %v514_v6, %v506_v2 }
 0xf96   :  { %899 = vtanh.f32 %v516_v7 }
 0xfa0   :  { %v900_v8 = vpop.eup %899 }
 0xfa1   :  { %519 = vrot.lane.b32.xlu1 %v900_v8, %s919_s14 }
0x1013   :  { %v520_v10 = vpop.permute.xlu1 %519 }
0x1014   :  { %v522_v11 = vmul.f32 %v898_v4, %v520_v10 }
0x1016   :  { %v1053_v12 = vpack.c.bf16 %v522_v11, %v522_v11 }
0x1018   :  { %535 = vrot.lane.b32.xlu0 %v1053_v12, %s920_s15 }
0x108a   :  { %v536_v13 = vpop.permute.xlu0 %535 }
0x108b   :  { %835 = vmatmul.mubr.msk.bf16.vlgmr.msra.gmra.mrb[12].mxu0 %vm16_vm0, %v536_v13 }
0x115e   :  { %v574_v16 = vpop.f32.mrb[12].mxu0 }
0x115f   :  { %v580_v17 = vadd.f32 %v574_v16, %v534_v15  ;;  %v836_v18 = vpop.f32.mrb[13].mxu0 }
0x1160   :  { %v577_v19 = vpop.f32.mrb[14].mxu0 }
0x1161   :  { %901 = vtanh.f32 %v580_v17  ;;  %v837_v20 = vpop.f32.mrb[15].mxu0  ;;  %v742_v22 = vmul.f32 -1.442695, %v580_v17 }
0x1163   :  { %903 = vpow2.f32 %v742_v22 }
0x116b   :  { %v902_v21 = vpop.eup %901 }
0x116c   :  { %590 = vrot.lane.b32.xlu1 %v902_v21, %s919_s14 }
0x116d   :  { %v904_v23 = vpop.eup %903 }
0x116e   :  { %v584_v24 = vadd.f32 1.0, %v904_v23 }
0x1170   :  { %905 = vrcp.f32 %v584_v24 }
0x117a   :  { %v906_v25 = vpop.eup %905 }
0x117b   :  { %v588_v29 = vmul.f32 %v906_v25, %v516_v7 }
0x11de   :  { %v591_v26 = vpop.permute.xlu1 %590 }
0x11df   :  { %v593_v28 = vmul.f32 %v906_v25, %v591_v26 }
0x11e1   :  { %595 = vrot.lane.b32.xlu0 %v593_v28, %s920_s15 }
0x1253   :  { %v596_v30 = vpop.permute.xlu0 %595 }
0x1254   :  { %v598_v32 = vadd.f32 %v596_v30, %v588_v29 }
0x1256   :  { %907 = vtanh.f32 %v598_v32 }
0x1260   :  { %v908_v33 = vpop.eup %907 }
0x1261   :  { %601 = vrot.lane.b32.xlu1 %v908_v33, %s919_s14 }
0x12d3   :  { %v602_v34 = vpop.permute.xlu1 %601 }
0x12d4   :  { %v604_v35 = vmul.f32 %v906_v25, %v602_v34 }
0x12d6   :  { %v605_v36 = vpack.c.bf16 %v604_v35, %v604_v35 }
0x12d8   :  { %617 = vrot.lane.b32.xlu0 %v605_v36, %s920_s15 }
0x134a   :  { %v618_v37 = vpop.permute.xlu0 %617 }
0x134b   :  { %843 = vmatmul.mubr.msk.bf16.vlgmr.msra.gmra.mrb[12].mxu1 %vm16_vm0, %v618_v37 }
0x141e   :  { %v656_v39 = vpop.f32.mrb[12].mxu1 }
0x141f   :  { %v662_v40 = vadd.f32 %v656_v39, %v616_v38  ;;  %v844_v41 = vpop.f32.mrb[13].mxu1 }
0x1420   :  { %v659_v42 = vpop.f32.mrb[14].mxu1 }
0x1421   :  { %909 = vtanh.f32 %v662_v40  ;;  %v845_v43 = vpop.f32.mrb[15].mxu1  ;;  %v747_v45 = vmul.f32 -1.442695, %v662_v40 }
0x1423   :  { %911 = vpow2.f32 %v747_v45 }
0x142b   :  { %v910_v44 = vpop.eup %909 }
0x142c   :  { %672 = vrot.lane.b32.xlu1 %v910_v44, %s919_s14 }
0x142d   :  { %v912_v46 = vpop.eup %911 }
0x142e   :  { %v666_v47 = vadd.f32 1.0, %v912_v46 }
0x1430   :  { %913 = vrcp.f32 %v666_v47 }
0x143a   :  { %v914_v49 = vpop.eup %913 }
0x143b   :  { %v670_v52 = vmul.f32 %v914_v49, %v598_v32 }
0x149e   :  { %v673_v50 = vpop.permute.xlu1 %672 }
0x149f   :  { %v675_v51 = vmul.f32 %v914_v49, %v673_v50 }
0x14a1   :  { %677 = vrot.lane.b32.xlu0 %v675_v51, %s920_s15 }
0x14a5   :  { %117 = vrot.lane.b32.xlu0 %v979_v27, %s920_s15 }
0x14a9   :  { %281 = vrot.lane.b32.xlu0 %v1010_v9, %s920_s15 }
0x14ad   :  { %445 = vrot.lane.b32.xlu0 %v1040_v54, %s920_s15 }
0x14b1   :  { %609 = vrot.lane.b32.xlu0 %v605_v36, %s920_s15 }
0x1513   :  { %v678_v53 = vpop.permute.xlu0 %677 }
0x1514   :  { %v680_v55 = vadd.f32 %v678_v53, %v670_v52 }
0x1516   :  { %915 = vtanh.f32 %v680_v55 }
0x1517   :  { %v118_v56 = vpop.permute.xlu0 %117 }
0x1518   :  { %121 = vst.msk [vmem:[%s1120_s2] sm:$0xf] %vm120_vm2, %v118_v56 }
0x151b   :  { %v282_v27 = vpop.permute.xlu0 %281 }
0x151c   :  { %724 = vst.msk [vmem:[%s1120_s2 + $0x8] sm:$0xf] %vm120_vm2, %v282_v27 }
0x151f   :  { %v446_v9 = vpop.permute.xlu0 %445 }
0x1520   :  { %v916_v54 = vpop.eup %915  ;;  %734 = vst.msk [vmem:[%s1120_s2 + $0x10] sm:$0xf] %vm120_vm2, %v446_v9 }
0x1521   :  { %683 = vrot.lane.b32.xlu1 %v916_v54, %s919_s14 }
0x1523   :  { %v610_v57 = vpop.permute.xlu0 %609 }
0x1524   :  { %744 = vst.msk [vmem:[%s1120_s2 + $0x18] sm:$0xf] %vm120_vm2, %v610_v57 }
0x1525   :  { %199 = vrot.lane.b32.xlu1 %v993_v48, %s920_s15 }
0x1529   :  { %363 = vrot.lane.b32.xlu1 %v1024_v31, %s920_s15 }
0x152d   :  { %527 = vrot.lane.b32.xlu1 %v1053_v12, %s920_s15 }
0x1593   :  { %v684_v58 = vpop.permute.xlu1 %683 }
0x1594   :  { %v686_v59 = vmul.f32 %v914_v49, %v684_v58 }
0x1596   :  { %v757_v60 = vpack.c.bf16 %v686_v59, %v686_v59  ;;  %697 = vrot.lane.b32.xlu0 %v686_v59, %s920_s15 }
0x1597   :  { %v200_v61 = vpop.permute.xlu1 %199 }
0x1598   :  { %719 = vst.msk [vmem:[%s1120_s2 + $0x4] sm:$0xf] %vm120_vm2, %v200_v61  ;;  %691 = vrot.lane.b32.xlu1 %v757_v60, %s920_s15 }
0x159b   :  { %v364_v48 = vpop.permute.xlu1 %363 }
0x159c   :  { %729 = vst.msk [vmem:[%s1120_s2 + $0xc] sm:$0xf] %vm120_vm2, %v364_v48  ;;  %702 = vrot.lane.b32.xlu1 %v680_v55, %s921_s5 }
0x159f   :  { %v528_v31 = vpop.permute.xlu1 %527 }
0x15a0   :  { %739 = vst.msk [vmem:[%s1120_s2 + $0x14] sm:$0xf] %vm120_vm2, %v528_v31 }
0x1608   :  { %v698_v62 = vpop.permute.xlu0 %697 }
0x1609   :  { %700 = vst.msk [vmem:[#allocation2] sm:$0xff] %vm16_vm0, %v698_v62 }
0x160a   :  { %v692_v63 = vpop.permute.xlu1 %691 }
0x160b   :  { %749 = vst.msk [vmem:[%s1120_s2 + $0x1c] sm:$0xf] %vm120_vm2, %v692_v63 }
0x160e   :  { %v703_v1 = vpop.permute.xlu1 %702 }
0x160f   :  { %705 = vst.msk [vmem:[#allocation3] sm:$0xff] %vm16_vm0, %v703_v1 }

</bundles_post_ra>
